<compile_context>
chip_gen: v6e
topology: v6e:2x2x1
jax: 0.10.0
libtpu: 0.0.40
codegen_flags: <defaults>
</compile_context>

<pallas_src>
import jax
import jax.numpy as jnp
from jax.experimental import pallas as pl
from jax.experimental.pallas import tpu as pltpu

# ---- problem sizes (small, consistent with the module) ----
N = 16          # number of nodes
IN_DIM = 16     # GAT input feature dim
OUT_DIM = 8     # GAT per-head output dim
NUM_HEADS = 4
F = OUT_DIM * NUM_HEADS   # flattened GAT output (= semantic-attention in_dim)
M = 3           # number of metapaths
HID = 128       # SemanticAttention hidden_dim (module default)

MH = M * NUM_HEADS          # 12
MHN = MH * N                # 192
MF = M * F                  # 96
MHID = M * HID              # 384

NEG_SLOPE = 0.2
NEG_INF = -1e30


# --------------------------------------------------------------------------
# Fused kernel: M GATConvs + SemanticAttention, one invocation, all lane-dense.
# --------------------------------------------------------------------------
def han_kernel(h_ref, hflat_ref, wall_ref, erwb_ref, sel_ref, adjt_ref,
               rep_ref, bdmask_ref, segones_ref, bias_ref,
               w1bd_ref, b1row_ref, w2bd_ref, meanrow_ref, bexp_ref, istack_ref,
               out_ref):
    h = h_ref[...]                                                   # (N, IN)

    # --- projections (MXU, lane-dense) ---
    feat_all = jnp.dot(h, wall_ref[...],
                       preferred_element_type=jnp.float32)           # (N, M*F)
    er_b = jnp.dot(h, erwb_ref[...],
                   preferred_element_type=jnp.float32)               # (N, MH*N) dst scores, pre-broadcast
    el_row = jnp.dot(hflat_ref[...], sel_ref[...],
                     preferred_element_type=jnp.float32)             # (1, MH*N) src scores, lane-dense

    # --- attention scores for all metapaths/heads at once ---
    s = er_b + el_row                                                # (N, MH*N)
    s = jnp.where(s > 0, s, NEG_SLOPE * s)                           # leaky relu
    s = jnp.where(adjt_ref[...] > 0.0, s, NEG_INF)                   # edge mask
    # single per-row max: valid shift for every per-(m,h) segment softmax
    smax = jnp.max(s, axis=-1, keepdims=True)                        # (N, 1)
    p = jnp.exp(s - smax)                                            # exactly 0 on non-edges

    # per-segment denominators + broadcast in ONE MXU matmul (block-diag ones)
    denom = jnp.dot(p, segones_ref[...],
                    preferred_element_type=jnp.float32)              # (N, MH*N)
    r = pl.reciprocal(denom, approx=True)                            # EUP slot
    r = r * (2.0 - denom * r)                                        # one Newton step -> fp32-accurate
    alpha = p * r                                                    # (N, MH*N)

    # --- block-structured aggregation: ONE matmul for all M*H heads ---
    feat_bd = jnp.dot(rep_ref[...], feat_all,
                      preferred_element_type=jnp.float32) * bdmask_ref[...]   # (MH*N, M*F)
    rst = jnp.dot(alpha, feat_bd,
                  preferred_element_type=jnp.float32)                # (N, M*F)
    rst = rst + bias_ref[...]
    # ELU (clamped exp arg so the unselected branch never produces inf)
    z = jnp.where(rst > 0, rst, jnp.exp(jnp.minimum(rst, 0.0)) - 1.0)   # (N, M*F)

    # --- semantic attention, lane-dense (N, M*F) layout throughout ---
    t = jnp.tanh(jnp.dot(z, w1bd_ref[...],
                         preferred_element_type=jnp.float32)
                 + b1row_ref[...])                                   # (N, M*HID)
    tmean = jnp.dot(meanrow_ref[...], t,
                    preferred_element_type=jnp.float32)              # (1, M*HID) node mean
    w = jnp.dot(tmean, w2bd_ref[...],
                preferred_element_type=jnp.float32)                  # (1, M)

    # softmax over metapaths on the (1, M) row
    w = w - jnp.max(w, axis=-1, keepdims=True)
    e = jnp.exp(w)
    a = e / jnp.sum(e, axis=-1, keepdims=True)                       # (1, M)

    # weighted combine: broadcast a across lanes, then fold the M segments
    a_b = jnp.dot(a, bexp_ref[...],
                  preferred_element_type=jnp.float32)                # (1, M*F)
    out_ref[...] = jnp.dot(z * a_b, istack_ref[...],
                           preferred_element_type=jnp.float32)       # (N, F)


# --------------------------------------------------------------------------
# Wrapper: parameter packing (plain XLA, would be done once at load time in a
# real model) + single fused pallas_call.
# --------------------------------------------------------------------------
@jax.jit
def han_layer_forward(h, W, attn_l, attn_r, bias, adj, W1, b1, W2):
    eyeN = jnp.eye(N, dtype=jnp.float32)

    # fc weights of all metapaths concatenated along lanes
    W_all = jnp.transpose(W, (1, 0, 2)).reshape(IN_DIM, MF)          # (IN, M*F)

    # attention vectors pre-fused into the projection
    Wr = W.reshape(M, IN_DIM, NUM_HEADS, OUT_DIM)
    ar = attn_r.reshape(M, NUM_HEADS, OUT_DIM)
    al = attn_l.reshape(M, NUM_HEADS, OUT_DIM)
    ERW = jnp.einsum('mihd,mhd->imh', Wr, ar).reshape(IN_DIM, MH)    # (IN, MH)
    ELW = jnp.einsum('mihd,mhd->mhi', Wr, al).reshape(MH, IN_DIM)    # (MH, IN)

    # dst-score projection with the per-head lane broadcast pre-applied
    ERW_b = jnp.repeat(ERW, N, axis=1)                               # (IN, MH*N)
    # src-score scatter matrix: S_el[src*IN + c, i*N + src] = ELW[i, c]
    S_el = jnp.einsum('ic,st->scit', ELW, eyeN).reshape(N * IN_DIM, MHN)
    h_flat = h.reshape(1, N * IN_DIM)

    # adjacency pre-tiled per head: adj_t[dst, (m*H+h)*N + src] = adj[m, dst, src]
    adj_t = jnp.broadcast_to(jnp.transpose(adj, (1, 0, 2))[:, :, None, :],
                             (N, M, NUM_HEADS, N)).reshape(N, MHN)

    # block-structure constants
    Rep = jnp.tile(eyeN, (MH, 1))                                    # (MH*N, N)  replication
    colmask = jnp.repeat(jnp.eye(MH, dtype=jnp.float32), OUT_DIM, axis=1)   # (MH, M*F)
    bd_mask = jnp.repeat(colmask, N, axis=0)                         # (MH*N, M*F)
    seg_ones = jnp.kron(jnp.eye(MH, dtype=jnp.float32),
                        jnp.ones((N, N), jnp.float32))               # (MH*N, MH*N)

    bias_row = bias.reshape(1, MF)                                   # (1, M*F)
    W1_bd = jnp.kron(jnp.eye(M, dtype=jnp.float32), W1)              # (M*F, M*HID)
    b1_row = jnp.tile(b1, (1, M))                                    # (1, M*HID)
    W2_bd = jnp.kron(jnp.eye(M, dtype=jnp.float32), W2)              # (M*HID, M)
    mean_row = jnp.full((1, N), 1.0 / N, jnp.float32)                # (1, N)
    Bexp = jnp.repeat(jnp.eye(M, dtype=jnp.float32), F, axis=1)      # (M, M*F)
    I_stack = jnp.tile(jnp.eye(F, dtype=jnp.float32), (M, 1))        # (M*F, F)

    def fullspec(shape):
        return pl.BlockSpec(shape, lambda i: (0,) * len(shape))

    return pl.pallas_call(
        han_kernel,
        out_shape=jax.ShapeDtypeStruct((N, F), jnp.float32),
        grid=(1,),
        in_specs=[
            fullspec((N, IN_DIM)),          # h
            fullspec((1, N * IN_DIM)),      # h_flat
            fullspec((IN_DIM, MF)),         # W_all
            fullspec((IN_DIM, MHN)),        # ERW_b
            fullspec((N * IN_DIM, MHN)),    # S_el
            fullspec((N, MHN)),             # adj_t
            fullspec((MHN, N)),             # Rep
            fullspec((MHN, MF)),            # bd_mask
            fullspec((MHN, MHN)),           # seg_ones
            fullspec((1, MF)),              # bias_row
            fullspec((MF, MHID)),           # W1_bd
            fullspec((1, MHID)),            # b1_row
            fullspec((MHID, M)),            # W2_bd
            fullspec((1, N)),               # mean_row
            fullspec((M, MF)),              # Bexp
            fullspec((MF, F)),              # I_stack
        ],
        out_specs=pl.BlockSpec((N, F), lambda i: (0, 0)),
        compiler_params=pltpu.CompilerParams(
            dimension_semantics=("arbitrary",)),
    )(h, h_flat, W_all, ERW_b, S_el, adj_t, Rep, bd_mask, seg_ones,
      bias_row, W1_bd, b1_row, W2_bd, mean_row, Bexp, I_stack)


# --------------------------------------------------------------------------
# Pure-JAX reference (same math, for a correctness check)
# --------------------------------------------------------------------------
def reference(h, W, attn_l, attn_r, bias, adj, W1, b1, W2):
    zs = []
    for m in range(M):
        feat = h @ W[m]                                  # (N, F)
        fh = feat.reshape(N, NUM_HEADS, OUT_DIM)
        el = jnp.sum(fh * attn_l[m].reshape(1, NUM_HEADS, OUT_DIM), axis=-1)
        er = jnp.sum(fh * attn_r[m].reshape(1, NUM_HEADS, OUT_DIM), axis=-1)
        heads = []
        mask = adj[m] > 0.0
        for hd in range(NUM_HEADS):
            s = er[:, hd][:, None] + el[:, hd][None, :]
            s = jnp.where(s > 0, s, NEG_SLOPE * s)
            s = jnp.where(mask, s, NEG_INF)
            p = jnp.exp(s - jnp.max(s, axis=-1, keepdims=True)) * adj[m]
            alpha = p / jnp.sum(p, axis=-1, keepdims=True)
            heads.append(alpha @ fh[:, hd, :])
        rst = jnp.concatenate(heads, axis=-1) + bias[m][None, :]
        rst = jnp.where(rst > 0, rst, jnp.exp(rst) - 1.0)
        zs.append(rst)
    z_m = jnp.stack(zs, axis=1)                          # (N, M, F)
    w = jnp.tanh(z_m @ W1 + b1) @ W2                     # (N, M, 1)
    w = jnp.mean(w, axis=0)                              # (M, 1)
    a = jax.nn.softmax(w, axis=0)                        # (M, 1)
    return jnp.sum(z_m * a[None, :, :], axis=1)          # (N, F)


# --------------------------------------------------------------------------
if __name__ == "__main__":
    key = jax.random.PRNGKey(0)
    keys = jax.random.split(key, 10)

    # deterministic "parameters"
    h = jax.random.normal(keys[0], (N, IN_DIM), jnp.float32)
    W = 0.2 * jax.random.normal(keys[1], (M, IN_DIM, F), jnp.float32)        # GAT fc
    attn_l = 0.2 * jax.random.normal(keys[2], (M, F), jnp.float32)
    attn_r = 0.2 * jax.random.normal(keys[3], (M, F), jnp.float32)
    bias = 0.1 * jax.random.normal(keys[4], (M, F), jnp.float32)
    W1 = 0.2 * jax.random.normal(keys[5], (F, HID), jnp.float32)             # semantic attn
    b1 = 0.1 * jax.random.normal(keys[6], (1, HID), jnp.float32)
    W2 = 0.2 * jax.random.normal(keys[7], (HID, 1), jnp.float32)

    # dense adjacency per metapath: random edges + self loops (adj[dst, src])
    rnd = jax.random.uniform(keys[8], (M, N, N))
    eye = jnp.eye(N, dtype=jnp.float32)[None, :, :]
    adj = jnp.maximum((rnd < 0.3).astype(jnp.float32), eye)

    out = han_layer_forward(h, W, attn_l, attn_r, bias, adj, W1, b1, W2)
    out = jax.block_until_ready(out)

    ref = reference(h, W, attn_l, attn_r, bias, adj, W1, b1, W2)
    err = float(jnp.max(jnp.abs(out - ref)))
    assert out.shape == (N, F), out.shape
    assert err < 1e-3, f"mismatch vs reference: {err}"

    print("KERNEL_OK")
</pallas_src>

<mosaic_0001>
module attributes {stable_mosaic.version = 11 : i64} {
  func.func @han_kernel(%arg0: i32, %arg1: memref<16x16xf32, #tpu.memory_space<vmem>>, %arg2: memref<1x256xf32, #tpu.memory_space<vmem>>, %arg3: memref<16x96xf32, #tpu.memory_space<vmem>>, %arg4: memref<16x192xf32, #tpu.memory_space<vmem>>, %arg5: memref<256x192xf32, #tpu.memory_space<vmem>>, %arg6: memref<16x192xf32, #tpu.memory_space<vmem>>, %arg7: memref<192x16xf32, #tpu.memory_space<vmem>>, %arg8: memref<192x96xf32, #tpu.memory_space<vmem>>, %arg9: memref<192x192xf32, #tpu.memory_space<vmem>>, %arg10: memref<1x96xf32, #tpu.memory_space<vmem>>, %arg11: memref<96x384xf32, #tpu.memory_space<vmem>>, %arg12: memref<1x384xf32, #tpu.memory_space<vmem>>, %arg13: memref<384x3xf32, #tpu.memory_space<vmem>>, %arg14: memref<1x16xf32, #tpu.memory_space<vmem>>, %arg15: memref<3x96xf32, #tpu.memory_space<vmem>>, %arg16: memref<96x32xf32, #tpu.memory_space<vmem>>, %arg17: memref<16x32xf32, #tpu.memory_space<vmem>>) attributes {dimension_semantics = [#tpu.dimension_semantics<arbitrary>], iteration_bounds = array<i64: 1>, scalar_prefetch = 0 : i64, scratch_operands = 0 : i64, tpu.core_type = #tpu.core_type<tc>, window_params = [{pipeline_mode = #tpu.pipeline_mode<synchronous>, transform_indices = @transform_0, window_bounds = array<i64: 16, 16>}, {pipeline_mode = #tpu.pipeline_mode<synchronous>, transform_indices = @transform_1, window_bounds = array<i64: 1, 256>}, {pipeline_mode = #tpu.pipeline_mode<synchronous>, transform_indices = @transform_2, window_bounds = array<i64: 16, 96>}, {pipeline_mode = #tpu.pipeline_mode<synchronous>, transform_indices = @transform_3, window_bounds = array<i64: 16, 192>}, {pipeline_mode = #tpu.pipeline_mode<synchronous>, transform_indices = @transform_4, window_bounds = array<i64: 256, 192>}, {pipeline_mode = #tpu.pipeline_mode<synchronous>, transform_indices = @transform_5, window_bounds = array<i64: 16, 192>}, {pipeline_mode = #tpu.pipeline_mode<synchronous>, transform_indices = @transform_6, window_bounds = array<i64: 192, 16>}, {pipeline_mode = #tpu.pipeline_mode<synchronous>, transform_indices = @transform_7, window_bounds = array<i64: 192, 96>}, {pipeline_mode = #tpu.pipeline_mode<synchronous>, transform_indices = @transform_8, window_bounds = array<i64: 192, 192>}, {pipeline_mode = #tpu.pipeline_mode<synchronous>, transform_indices = @transform_9, window_bounds = array<i64: 1, 96>}, {pipeline_mode = #tpu.pipeline_mode<synchronous>, transform_indices = @transform_10, window_bounds = array<i64: 96, 384>}, {pipeline_mode = #tpu.pipeline_mode<synchronous>, transform_indices = @transform_11, window_bounds = array<i64: 1, 384>}, {pipeline_mode = #tpu.pipeline_mode<synchronous>, transform_indices = @transform_12, window_bounds = array<i64: 384, 3>}, {pipeline_mode = #tpu.pipeline_mode<synchronous>, transform_indices = @transform_13, window_bounds = array<i64: 1, 16>}, {pipeline_mode = #tpu.pipeline_mode<synchronous>, transform_indices = @transform_14, window_bounds = array<i64: 3, 96>}, {pipeline_mode = #tpu.pipeline_mode<synchronous>, transform_indices = @transform_15, window_bounds = array<i64: 96, 32>}, {pipeline_mode = #tpu.pipeline_mode<synchronous>, transform_indices = @transform_16, window_bounds = array<i64: 16, 32>}]} {
    %c0 = arith.constant 0 : index
    %c0_0 = arith.constant 0 : index
    %0 = vector.load %arg1[%c0, %c0_0] : memref<16x16xf32, #tpu.memory_space<vmem>>, vector<16x16xf32>
    %c0_1 = arith.constant 0 : index
    %c0_2 = arith.constant 0 : index
    %1 = vector.load %arg3[%c0_1, %c0_2] : memref<16x96xf32, #tpu.memory_space<vmem>>, vector<16x96xf32>
    %cst = arith.constant dense<0.000000e+00> : vector<16x96xf32>
    %2 = tpu.matmul %0, %1, %cst {dimension_numbers = #tpu.dot_dimension_numbers<[1], [0], [0], [1], [0, 0, 1, 1], [], []>} : vector<16x16xf32>, vector<16x96xf32>, vector<16x96xf32> -> vector<16x96xf32>
    %c0_3 = arith.constant 0 : index
    %c0_4 = arith.constant 0 : index
    %3 = vector.load %arg4[%c0_3, %c0_4] : memref<16x192xf32, #tpu.memory_space<vmem>>, vector<16x192xf32>
    %cst_5 = arith.constant dense<0.000000e+00> : vector<16x192xf32>
    %4 = tpu.matmul %0, %3, %cst_5 {dimension_numbers = #tpu.dot_dimension_numbers<[1], [0], [0], [1], [0, 0, 1, 1], [], []>} : vector<16x16xf32>, vector<16x192xf32>, vector<16x192xf32> -> vector<16x192xf32>
    %c0_6 = arith.constant 0 : index
    %c0_7 = arith.constant 0 : index
    %5 = vector.load %arg2[%c0_6, %c0_7] : memref<1x256xf32, #tpu.memory_space<vmem>>, vector<1x256xf32>
    %c0_8 = arith.constant 0 : index
    %c0_9 = arith.constant 0 : index
    %6 = vector.load %arg5[%c0_8, %c0_9] : memref<256x192xf32, #tpu.memory_space<vmem>>, vector<256x192xf32>
    %cst_10 = arith.constant dense<0.000000e+00> : vector<1x192xf32>
    %7 = tpu.matmul %5, %6, %cst_10 {dimension_numbers = #tpu.dot_dimension_numbers<[1], [0], [0], [1], [0, 0, 1, 1], [], []>} : vector<1x256xf32>, vector<256x192xf32>, vector<1x192xf32> -> vector<1x192xf32>
    %8 = vector.broadcast %7 : vector<1x192xf32> to vector<16x192xf32>
    %9 = arith.addf %4, %8 : vector<16x192xf32>
    %cst_11 = arith.constant 0.000000e+00 : f32
    %10 = vector.broadcast %cst_11 : f32 to vector<16x192xf32>
    %11 = arith.cmpf ogt, %9, %10 : vector<16x192xf32>
    %cst_12 = arith.constant 2.000000e-01 : f32
    %12 = vector.broadcast %cst_12 : f32 to vector<16x192xf32>
    %13 = arith.mulf %12, %9 : vector<16x192xf32>
    %14 = arith.select %11, %9, %13 : vector<16x192xi1>, vector<16x192xf32>
    %c0_13 = arith.constant 0 : index
    %c0_14 = arith.constant 0 : index
    %15 = vector.load %arg6[%c0_13, %c0_14] : memref<16x192xf32, #tpu.memory_space<vmem>>, vector<16x192xf32>
    %cst_15 = arith.constant 0.000000e+00 : f32
    %16 = vector.broadcast %cst_15 : f32 to vector<16x192xf32>
    %17 = arith.cmpf ogt, %15, %16 : vector<16x192xf32>
    %cst_16 = arith.constant -1.000000e+30 : f32
    %18 = vector.broadcast %cst_16 : f32 to vector<16x192xf32>
    %19 = arith.select %17, %14, %18 : vector<16x192xi1>, vector<16x192xf32>
    %cst_17 = arith.constant dense<0xFF800000> : vector<16xf32>
    %20 = vector.multi_reduction <maximumf>, %19, %cst_17 [1] : vector<16x192xf32> to vector<16xf32>
    %21 = vector.shape_cast %20 : vector<16xf32> to vector<16x1xf32>
    %22 = vector.broadcast %21 : vector<16x1xf32> to vector<16x192xf32>
    %23 = arith.subf %19, %22 : vector<16x192xf32>
    %24 = math.exp %23 : vector<16x192xf32>
    %c0_18 = arith.constant 0 : index
    %c0_19 = arith.constant 0 : index
    %25 = vector.load %arg9[%c0_18, %c0_19] : memref<192x192xf32, #tpu.memory_space<vmem>>, vector<192x192xf32>
    %cst_20 = arith.constant dense<0.000000e+00> : vector<16x192xf32>
    %26 = tpu.matmul %24, %25, %cst_20 {dimension_numbers = #tpu.dot_dimension_numbers<[1], [0], [0], [1], [0, 0, 1, 1], [], []>} : vector<16x192xf32>, vector<192x192xf32>, vector<16x192xf32> -> vector<16x192xf32>
    %27 = tpu.reciprocal %26 {approx = true} : vector<16x192xf32> -> vector<16x192xf32>
    %28 = arith.mulf %26, %27 : vector<16x192xf32>
    %cst_21 = arith.constant 2.000000e+00 : f32
    %29 = vector.broadcast %cst_21 : f32 to vector<16x192xf32>
    %30 = arith.subf %29, %28 : vector<16x192xf32>
    %31 = arith.mulf %27, %30 : vector<16x192xf32>
    %32 = arith.mulf %24, %31 : vector<16x192xf32>
    %c0_22 = arith.constant 0 : index
    %c0_23 = arith.constant 0 : index
    %33 = vector.load %arg7[%c0_22, %c0_23] : memref<192x16xf32, #tpu.memory_space<vmem>>, vector<192x16xf32>
    %cst_24 = arith.constant dense<0.000000e+00> : vector<192x96xf32>
    %34 = tpu.matmul %33, %2, %cst_24 {dimension_numbers = #tpu.dot_dimension_numbers<[1], [0], [0], [1], [0, 0, 1, 1], [], []>} : vector<192x16xf32>, vector<16x96xf32>, vector<192x96xf32> -> vector<192x96xf32>
    %c0_25 = arith.constant 0 : index
    %c0_26 = arith.constant 0 : index
    %35 = vector.load %arg8[%c0_25, %c0_26] : memref<192x96xf32, #tpu.memory_space<vmem>>, vector<192x96xf32>
    %36 = arith.mulf %34, %35 : vector<192x96xf32>
    %cst_27 = arith.constant dense<0.000000e+00> : vector<16x96xf32>
    %37 = tpu.matmul %32, %36, %cst_27 {dimension_numbers = #tpu.dot_dimension_numbers<[1], [0], [0], [1], [0, 0, 1, 1], [], []>} : vector<16x192xf32>, vector<192x96xf32>, vector<16x96xf32> -> vector<16x96xf32>
    %c0_28 = arith.constant 0 : index
    %c0_29 = arith.constant 0 : index
    %38 = vector.load %arg10[%c0_28, %c0_29] : memref<1x96xf32, #tpu.memory_space<vmem>>, vector<1x96xf32>
    %39 = vector.broadcast %38 : vector<1x96xf32> to vector<16x96xf32>
    %40 = arith.addf %37, %39 : vector<16x96xf32>
    %cst_30 = arith.constant 0.000000e+00 : f32
    %41 = vector.broadcast %cst_30 : f32 to vector<16x96xf32>
    %42 = arith.cmpf ogt, %40, %41 : vector<16x96xf32>
    %cst_31 = arith.constant 0.000000e+00 : f32
    %43 = vector.broadcast %cst_31 : f32 to vector<16x96xf32>
    %44 = arith.minimumf %40, %43 : vector<16x96xf32>
    %45 = math.exp %44 : vector<16x96xf32>
    %cst_32 = arith.constant 1.000000e+00 : f32
    %46 = vector.broadcast %cst_32 : f32 to vector<16x96xf32>
    %47 = arith.subf %45, %46 : vector<16x96xf32>
    %48 = arith.select %42, %40, %47 : vector<16x96xi1>, vector<16x96xf32>
    %c0_33 = arith.constant 0 : index
    %c0_34 = arith.constant 0 : index
    %49 = vector.load %arg11[%c0_33, %c0_34] : memref<96x384xf32, #tpu.memory_space<vmem>>, vector<96x384xf32>
    %cst_35 = arith.constant dense<0.000000e+00> : vector<16x384xf32>
    %50 = tpu.matmul %48, %49, %cst_35 {dimension_numbers = #tpu.dot_dimension_numbers<[1], [0], [0], [1], [0, 0, 1, 1], [], []>} : vector<16x96xf32>, vector<96x384xf32>, vector<16x384xf32> -> vector<16x384xf32>
    %c0_36 = arith.constant 0 : index
    %c0_37 = arith.constant 0 : index
    %51 = vector.load %arg12[%c0_36, %c0_37] : memref<1x384xf32, #tpu.memory_space<vmem>>, vector<1x384xf32>
    %52 = vector.broadcast %51 : vector<1x384xf32> to vector<16x384xf32>
    %53 = arith.addf %50, %52 : vector<16x384xf32>
    %54 = math.tanh %53 : vector<16x384xf32>
    %c0_38 = arith.constant 0 : index
    %c0_39 = arith.constant 0 : index
    %55 = vector.load %arg14[%c0_38, %c0_39] : memref<1x16xf32, #tpu.memory_space<vmem>>, vector<1x16xf32>
    %cst_40 = arith.constant dense<0.000000e+00> : vector<1x384xf32>
    %56 = tpu.matmul %55, %54, %cst_40 {dimension_numbers = #tpu.dot_dimension_numbers<[1], [0], [0], [1], [0, 0, 1, 1], [], []>} : vector<1x16xf32>, vector<16x384xf32>, vector<1x384xf32> -> vector<1x384xf32>
    %c0_41 = arith.constant 0 : index
    %c0_42 = arith.constant 0 : index
    %57 = vector.load %arg13[%c0_41, %c0_42] : memref<384x3xf32, #tpu.memory_space<vmem>>, vector<384x3xf32>
    %cst_43 = arith.constant dense<0.000000e+00> : vector<1x3xf32>
    %58 = tpu.matmul %56, %57, %cst_43 {dimension_numbers = #tpu.dot_dimension_numbers<[1], [0], [0], [1], [0, 0, 1, 1], [], []>} : vector<1x384xf32>, vector<384x3xf32>, vector<1x3xf32> -> vector<1x3xf32>
    %cst_44 = arith.constant dense<0xFF800000> : vector<1xf32>
    %59 = vector.multi_reduction <maximumf>, %58, %cst_44 [1] : vector<1x3xf32> to vector<1xf32>
    %60 = vector.shape_cast %59 : vector<1xf32> to vector<1x1xf32>
    %61 = vector.broadcast %60 : vector<1x1xf32> to vector<1x3xf32>
    %62 = arith.subf %58, %61 : vector<1x3xf32>
    %63 = math.exp %62 : vector<1x3xf32>
    %cst_45 = arith.constant dense<0.000000e+00> : vector<1xf32>
    %64 = vector.multi_reduction <add>, %63, %cst_45 [1] : vector<1x3xf32> to vector<1xf32>
    %65 = vector.shape_cast %64 : vector<1xf32> to vector<1x1xf32>
    %66 = vector.broadcast %65 : vector<1x1xf32> to vector<1x3xf32>
    %67 = arith.divf %63, %66 : vector<1x3xf32>
    %c0_46 = arith.constant 0 : index
    %c0_47 = arith.constant 0 : index
    %68 = vector.load %arg15[%c0_46, %c0_47] : memref<3x96xf32, #tpu.memory_space<vmem>>, vector<3x96xf32>
    %cst_48 = arith.constant dense<0.000000e+00> : vector<1x96xf32>
    %69 = tpu.matmul %67, %68, %cst_48 {dimension_numbers = #tpu.dot_dimension_numbers<[1], [0], [0], [1], [0, 0, 1, 1], [], []>} : vector<1x3xf32>, vector<3x96xf32>, vector<1x96xf32> -> vector<1x96xf32>
    %70 = vector.broadcast %69 : vector<1x96xf32> to vector<16x96xf32>
    %71 = arith.mulf %48, %70 : vector<16x96xf32>
    %c0_49 = arith.constant 0 : index
    %c0_50 = arith.constant 0 : index
    %72 = vector.load %arg16[%c0_49, %c0_50] : memref<96x32xf32, #tpu.memory_space<vmem>>, vector<96x32xf32>
    %cst_51 = arith.constant dense<0.000000e+00> : vector<16x32xf32>
    %73 = tpu.matmul %71, %72, %cst_51 {dimension_numbers = #tpu.dot_dimension_numbers<[1], [0], [0], [1], [0, 0, 1, 1], [], []>} : vector<16x96xf32>, vector<96x32xf32>, vector<16x32xf32> -> vector<16x32xf32>
    %c0_52 = arith.constant 0 : index
    %c0_53 = arith.constant 0 : index
    %74 = vector.load %arg17[%c0_52, %c0_53] : memref<16x32xf32, #tpu.memory_space<vmem>>, vector<16x32xf32>
    tpu.vector_store %arg17[%c0_52, %c0_53], %73 {strides = array<i32>} : memref<16x32xf32, #tpu.memory_space<vmem>>, vector<16x32xf32>,
    return
  }
  func.func @transform_0(%arg0: i32) -> (i32, i32) {
    %c0_i32 = arith.constant 0 : i32
    %c0_i32_0 = arith.constant 0 : i32
    %c0_i32_1 = arith.constant 0 : i32
    return %c0_i32, %c0_i32_0 : i32, i32
  }
  func.func @transform_1(%arg0: i32) -> (i32, i32) {
    %c0_i32 = arith.constant 0 : i32
    %c0_i32_0 = arith.constant 0 : i32
    %c0_i32_1 = arith.constant 0 : i32
    return %c0_i32, %c0_i32_0 : i32, i32
  }
  func.func @transform_2(%arg0: i32) -> (i32, i32) {
    %c0_i32 = arith.constant 0 : i32
    %c0_i32_0 = arith.constant 0 : i32
    %c0_i32_1 = arith.constant 0 : i32
    return %c0_i32, %c0_i32_0 : i32, i32
  }
  func.func @transform_3(%arg0: i32) -> (i32, i32) {
    %c0_i32 = arith.constant 0 : i32
    %c0_i32_0 = arith.constant 0 : i32
    %c0_i32_1 = arith.constant 0 : i32
    return %c0_i32, %c0_i32_0 : i32, i32
  }
  func.func @transform_4(%arg0: i32) -> (i32, i32) {
    %c0_i32 = arith.constant 0 : i32
    %c0_i32_0 = arith.constant 0 : i32
    %c0_i32_1 = arith.constant 0 : i32
    return %c0_i32, %c0_i32_0 : i32, i32
  }
  func.func @transform_5(%arg0: i32) -> (i32, i32) {
    %c0_i32 = arith.constant 0 : i32
    %c0_i32_0 = arith.constant 0 : i32
    %c0_i32_1 = arith.constant 0 : i32
    return %c0_i32, %c0_i32_0 : i32, i32
  }
  func.func @transform_6(%arg0: i32) -> (i32, i32) {
    %c0_i32 = arith.constant 0 : i32
    %c0_i32_0 = arith.constant 0 : i32
    %c0_i32_1 = arith.constant 0 : i32
    return %c0_i32, %c0_i32_0 : i32, i32
  }
  func.func @transform_7(%arg0: i32) -> (i32, i32) {
    %c0_i32 = arith.constant 0 : i32
    %c0_i32_0 = arith.constant 0 : i32
    %c0_i32_1 = arith.constant 0 : i32
    return %c0_i32, %c0_i32_0 : i32, i32
  }
  func.func @transform_8(%arg0: i32) -> (i32, i32) {
    %c0_i32 = arith.constant 0 : i32
    %c0_i32_0 = arith.constant 0 : i32
    %c0_i32_1 = arith.constant 0 : i32
    return %c0_i32, %c0_i32_0 : i32, i32
  }
  func.func @transform_9(%arg0: i32) -> (i32, i32) {
    %c0_i32 = arith.constant 0 : i32
    %c0_i32_0 = arith.constant 0 : i32
    %c0_i32_1 = arith.constant 0 : i32
    return %c0_i32, %c0_i32_0 : i32, i32
  }
  func.func @transform_10(%arg0: i32) -> (i32, i32) {
    %c0_i32 = arith.constant 0 : i32
    %c0_i32_0 = arith.constant 0 : i32
    %c0_i32_1 = arith.constant 0 : i32
    return %c0_i32, %c0_i32_0 : i32, i32
  }
  func.func @transform_11(%arg0: i32) -> (i32, i32) {
    %c0_i32 = arith.constant 0 : i32
    %c0_i32_0 = arith.constant 0 : i32
    %c0_i32_1 = arith.constant 0 : i32
    return %c0_i32, %c0_i32_0 : i32, i32
  }
  func.func @transform_12(%arg0: i32) -> (i32, i32) {
    %c0_i32 = arith.constant 0 : i32
    %c0_i32_0 = arith.constant 0 : i32
    %c0_i32_1 = arith.constant 0 : i32
    return %c0_i32, %c0_i32_0 : i32, i32
  }
  func.func @transform_13(%arg0: i32) -> (i32, i32) {
    %c0_i32 = arith.constant 0 : i32
    %c0_i32_0 = arith.constant 0 : i32
    %c0_i32_1 = arith.constant 0 : i32
    return %c0_i32, %c0_i32_0 : i32, i32
  }
  func.func @transform_14(%arg0: i32) -> (i32, i32) {
    %c0_i32 = arith.constant 0 : i32
    %c0_i32_0 = arith.constant 0 : i32
    %c0_i32_1 = arith.constant 0 : i32
    return %c0_i32, %c0_i32_0 : i32, i32
  }
  func.func @transform_15(%arg0: i32) -> (i32, i32) {
    %c0_i32 = arith.constant 0 : i32
    %c0_i32_0 = arith.constant 0 : i32
    %c0_i32_1 = arith.constant 0 : i32
    return %c0_i32, %c0_i32_0 : i32, i32
  }
  func.func @transform_16(%arg0: i32) -> (i32, i32) {
    %c0_i32 = arith.constant 0 : i32
    %c0_i32_0 = arith.constant 0 : i32
    %c0_i32_1 = arith.constant 0 : i32
    return %c0_i32, %c0_i32_0 : i32, i32
  }
}

</mosaic_0001>

<bundles_post_ra>
// kernel: han_layer_forward.1
= control target key start
LH: loop header
LB: loop body
LE: loop exit
PB: predicated region body
PF: predicated region fallthrough
CT: control target
= control target key end

     0   :  { %s3244_s0 = inlined_call_operand.vmem [shape: f32[16,16], index: 0, kind: input, shape index: {}]   ;;  %s3245_s1 = inlined_call_operand.vmem [shape: f32[1,256], index: 1, kind: input, shape index: {}]   ;;  %s3246_s2 = inlined_call_operand.vmem [shape: f32[16,96], index: 2, kind: input, shape index: {}]   ;;  %s3247_s3 = inlined_call_operand.vmem [shape: f32[16,192], index: 3, kind: input, shape index: {}]   ;;  %s3248_s4 = inlined_call_operand.vmem [shape: f32[256,192], index: 4, kind: input, shape index: {}]   ;;  %s3249_s5 = inlined_call_operand.vmem [shape: f32[16,192], index: 5, kind: input, shape index: {}]   ;;  %s3250_s6 = inlined_call_operand.vmem [shape: f32[192,16], index: 6, kind: input, shape index: {}]   ;;  %s3251_s7 = inlined_call_operand.vmem [shape: f32[192,96], index: 7, kind: input, shape index: {}]   ;;  %s3252_s8 = inlined_call_operand.vmem [shape: f32[192,192], index: 8, kind: input, shape index: {}]   ;;  %s3253_s9 = inlined_call_operand.vmem [shape: f32[1,96], index: 9, kind: input, shape index: {}]   ;;  %s3254_s10 = inlined_call_operand.vmem [shape: f32[96,384], index: 10, kind: input, shape index: {}]   ;;  %s3255_s11 = inlined_call_operand.vmem [shape: f32[1,384], index: 11, kind: input, shape index: {}]   ;;  %s3256_s12 = inlined_call_operand.vmem [shape: f32[384,3], index: 12, kind: input, shape index: {}]   ;;  %s3257_s13 = inlined_call_operand.vmem [shape: f32[1,16], index: 13, kind: input, shape index: {}]   ;;  %s3258_s14 = inlined_call_operand.vmem [shape: f32[3,96], index: 14, kind: input, shape index: {}]   ;;  %s3259_s15 = inlined_call_operand.vmem [shape: f32[96,32], index: 15, kind: input, shape index: {}]   ;;  %s3260_s16 = inlined_call_operand.hbm [shape: f32[16,32], index: 16, kind: output, shape index: {}]  }
   0x1   :  { %3262 = sst [smem:[#allocation5_spill]] %s3244_s0 }
   0x2   :  { %v57_v0 = vld [vmem:[%s3246_s2 + $0x8] sm:$0xff]  ;;  %v56_v1 = vld [vmem:[%s3246_s2] sm:$0xff]  ;;  %s3263_s27 = sld [smem:[#allocation5_spill]]  ;;  %vm58_vm0 = vcmask 130048   ;;  %v176_v4 = vld [vmem:[%s3248_s4 + $0xf8] sm:$0xff]  ;;  %v2132_v5 = vmov 0.0   ;;  %v210_v17 = vlaneseq }
   0x3   :  { %1921 = vmatprep.subr.mxu1 %v57_v0  ;;  %363 = vmatprep.mubr.f32.mxu0 %v2132_v5  ;;  %v175_v6 = vld [vmem:[%s3248_s4 + $0xf0] sm:$0xff]  ;;  %v174_v7 = vld [vmem:[%s3248_s4 + $0xe8] sm:$0xff]  ;;  %v173_v8 = vld [vmem:[%s3248_s4 + $0xe0] sm:$0xff] }
   0x4   :  { %1922 = vmatpush3.msra.mxu1 %v57_v0  ;;  %v172_v9 = vld [vmem:[%s3248_s4 + $0xd8] sm:$0xff]  ;;  %v171_v10 = vld [vmem:[%s3248_s4 + $0xd0] sm:$0xff]  ;;  %v170_v11 = vld [vmem:[%s3248_s4 + $0xc8] sm:$0xff]  ;;  %v2291_v22 = vshrl.u32 %v210_v17, 7 }
   0x5   :  { %1923 = vmatprep.subr.mxu1 %v56_v1  ;;  %v169_v12 = vld [vmem:[%s3248_s4 + $0xc0] sm:$0xff]  ;;  %v168_v13 = vld [vmem:[%s3248_s4 + $0xb8] sm:$0xff]  ;;  %v167_v14 = vld [vmem:[%s3248_s4 + $0xb0] sm:$0xff] }
   0x6   :  { %1924 = vmatpush3.msra.mxu1 %v56_v1  ;;  %v166_v15 = vld [vmem:[%s3248_s4 + $0xa8] sm:$0xff]  ;;  %v165_v16 = vld [vmem:[%s3248_s4 + $0xa0] sm:$0xff]  ;;  %v164_v18 = vld [vmem:[%s3248_s4 + $0x98] sm:$0xff]  ;;  %v216_v29 = vsub.s32 1, %v2291_v22 }
   0x7   :  { %220 = vmatprep.subr.mxu1 %v176_v4  ;;  %v163_v19 = vld [vmem:[%s3248_s4 + $0x90] sm:$0xff]  ;;  %v162_v20 = vld [vmem:[%s3248_s4 + $0x88] sm:$0xff]  ;;  %v161_v21 = vld [vmem:[%s3248_s4 + $0x80] sm:$0xff] }
   0x8   :  { %v2231_v2 = vld [vmem:[%s3263_s27] sm:$0xff]  ;;  %v2238_v3 = vld [vmem:[%s3263_s27 + $0x8] sm:$0xff]  ;;  %v160_v23 = vld [vmem:[%s3248_s4 + $0x78] sm:$0xff] }
   0x9   :  { %1925 = vmatprep.mubr.msk.f32.mxu1 %vm58_vm0, %v2231_v2  ;;  %v159_v24 = vld [vmem:[%s3248_s4 + $0x70] sm:$0xff]  ;;  %v158_v25 = vld [vmem:[%s3248_s4 + $0x68] sm:$0xff]  ;;  %v157_v26 = vld [vmem:[%s3248_s4 + $0x60] sm:$0xff] }
   0xa   :  { %1926 = vmatmul.mubr.msk.f32.vlgmr.msra.gmra.mxu1 %vm58_vm0, %v2238_v3  ;;  %v143_v27 = vld [vmem:[%s3247_s3 + $0x18] sm:$0xff]  ;;  %v142_v28 = vld [vmem:[%s3247_s3 + $0x10] sm:$0xff]  ;;  %v141_v31 = vld [vmem:[%s3247_s3 + $0x8] sm:$0xff] }
   0xb   :  { %221 = vmatpush1.msra.mxu1 %v175_v6  ;;  %v156_v30 = vld [vmem:[%s3248_s4 + $0x58] sm:$0xff]  ;;  %327 = vmatprep.subr.mxu0 %v143_v27  ;;  %v155_v32 = vld [vmem:[%s3248_s4 + $0x50] sm:$0xff]  ;;  %v140_v33 = vld [vmem:[%s3247_s3] sm:$0xff] }
   0xc   :  { %222 = vmatprep.subr.mxu1 %v174_v7  ;;  %328 = vmatpush1.msra.mxu0 %v142_v28  ;;  %v154_v34 = vld [vmem:[%s3248_s4 + $0x48] sm:$0xff]  ;;  %v2330_v35 = vld [vmem:[%s3245_s1] sm:$0x3]  ;;  %v152_v38 = vld [vmem:[%s3248_s4 + $0x38] sm:$0xff] }
   0xd   :  { %223 = vmatpush1.msra.mxu1 %v173_v8  ;;  %329 = vmatprep.subr.mxu0 %v141_v31  ;;  %v153_v36 = vld [vmem:[%s3248_s4 + $0x40] sm:$0xff]  ;;  %v217_v37 = vrot.slane %v2330_v35, %v216_v29  ;;  %v452_v39 = vld [vmem:[%s3252_s8 + $0xf8] sm:$0xff]  ;;  %v151_v40 = vld [vmem:[%s3248_s4 + $0x30] sm:$0xff] }
   0xe   :  { %224 = vmatprep.subr.mxu1 %v172_v9  ;;  %330 = vmatpush1.msra.mxu0 %v140_v33  ;;  %v150_v41 = vld [vmem:[%s3248_s4 + $0x28] sm:$0xff]  ;;  %v451_v42 = vld [vmem:[%s3252_s8 + $0xf0] sm:$0xff]  ;;  %v149_v43 = vld [vmem:[%s3248_s4 + $0x20] sm:$0xff] }
   0xf   :  { %225 = vmatpush1.msra.mxu1 %v171_v10  ;;  %1763 = vmatmul.mubr.msk.f32.vlgmr.msra.gmra.mxu0 %vm58_vm0, %v2231_v2  ;;  %v450_v44 = vld [vmem:[%s3252_s8 + $0xe8] sm:$0xff]  ;;  %v148_v45 = vld [vmem:[%s3248_s4 + $0x18] sm:$0xff]  ;;  %v449_v46 = vld [vmem:[%s3252_s8 + $0xe0] sm:$0xff] }
  0x10   :  { %226 = vmatprep.subr.mxu1 %v170_v11  ;;  %284 = vmatprep.mubr.f32.mxu1 %v217_v37  ;;  %v147_v47 = vld [vmem:[%s3248_s4 + $0x10] sm:$0xff]  ;;  %v448_v48 = vld [vmem:[%s3252_s8 + $0xd8] sm:$0xff]  ;;  %v146_v49 = vld [vmem:[%s3248_s4 + $0x8] sm:$0xff] }
  0x11   :  { %227 = vmatpush1.msra.mxu1 %v169_v12  ;;  %369 = vmatprep.mubr.f32.mxu0 %v2132_v5  ;;  %v447_v50 = vld [vmem:[%s3252_s8 + $0xd0] sm:$0xff]  ;;  %v145_v51 = vld [vmem:[%s3248_s4] sm:$0xff]  ;;  %v446_v52 = vld [vmem:[%s3252_s8 + $0xc8] sm:$0xff] }
  0x12   :  { %228 = vmatprep.subr.mxu1 %v168_v13  ;;  %475 = vmatprep.subr.mxu0 %v452_v39  ;;  %v208_v53 = vld [vmem:[%s3248_s4 + $0x1f8] sm:$0xff]  ;;  %v445_v54 = vld [vmem:[%s3252_s8 + $0xc0] sm:$0xff]  ;;  %v207_v55 = vld [vmem:[%s3248_s4 + $0x1f0] sm:$0xff] }
  0x13   :  { %229 = vmatpush1.msra.mxu1 %v167_v14  ;;  %1764 = vmatmul.mubr.msk.f32.gmra.mxu0 %vm58_vm0, %v2238_v3  ;;  %v444_v56 = vld [vmem:[%s3252_s8 + $0xb8] sm:$0xff]  ;;  %v206_v57 = vld [vmem:[%s3248_s4 + $0x1e8] sm:$0xff]  ;;  %v443_v58 = vld [vmem:[%s3252_s8 + $0xb0] sm:$0xff] }
  0x14   :  { %230 = vmatprep.subr.mxu1 %v166_v15  ;;  %476 = vmatpush1.msra.mxu0 %v451_v42  ;;  %v205_v59 = vld [vmem:[%s3248_s4 + $0x1e0] sm:$0xff]  ;;  %v442_v60 = vld [vmem:[%s3252_s8 + $0xa8] sm:$0xff]  ;;  %v204_v61 = vld [vmem:[%s3248_s4 + $0x1d8] sm:$0xff] }
  0x15   :  { %231 = vmatpush1.msra.mxu1 %v165_v16  ;;  %477 = vmatprep.subr.mxu0 %v450_v44  ;;  %v441_v62 = vld [vmem:[%s3252_s8 + $0xa0] sm:$0xff]  ;;  %v203_v63 = vld [vmem:[%s3248_s4 + $0x1d0] sm:$0xff]  ;;  %v440_v0 = vld [vmem:[%s3252_s8 + $0x98] sm:$0xff] }
  0x16   :  { %232 = vmatprep.subr.mxu1 %v164_v18  ;;  %478 = vmatpush1.msra.mxu0 %v449_v46 }
  0x17   :  { %233 = vmatpush1.msra.mxu1 %v163_v19  ;;  %479 = vmatprep.subr.mxu0 %v448_v48 }
  0x18   :  { %234 = vmatprep.subr.mxu1 %v162_v20  ;;  %480 = vmatpush1.msra.mxu0 %v447_v50 }
  0x19   :  { %235 = vmatpush1.msra.mxu1 %v161_v21  ;;  %481 = vmatprep.subr.mxu0 %v446_v52 }
  0x1a   :  { %236 = vmatprep.subr.mxu1 %v160_v23  ;;  %482 = vmatpush1.msra.mxu0 %v445_v54 }
  0x1b   :  { %237 = vmatpush1.msra.mxu1 %v159_v24  ;;  %483 = vmatprep.subr.mxu0 %v444_v56 }
  0x1c   :  { %238 = vmatprep.subr.mxu1 %v158_v25  ;;  %484 = vmatpush1.msra.mxu0 %v443_v58 }
  0x1d   :  { %239 = vmatpush1.msra.mxu1 %v157_v26 }
  0x1e   :  { %240 = vmatprep.subr.mxu1 %v156_v30 }
  0x1f   :  { %241 = vmatpush1.msra.mxu1 %v155_v32 }
  0x20   :  { %242 = vmatprep.subr.mxu1 %v154_v34 }
  0x21   :  { %243 = vmatpush1.msra.mxu1 %v153_v36 }
  0x22   :  { %244 = vmatprep.subr.mxu1 %v152_v38 }
  0x23   :  { %245 = vmatpush1.msra.mxu1 %v151_v40 }
  0x24   :  { %246 = vmatprep.subr.mxu1 %v150_v41 }
  0x25   :  { %247 = vmatpush1.msra.mxu1 %v149_v43 }
  0x26   :  { %248 = vmatprep.subr.mxu1 %v148_v45 }
  0x27   :  { %249 = vmatpush1.msra.mxu1 %v147_v47 }
  0x28   :  { %250 = vmatprep.subr.mxu1 %v146_v49 }
  0x29   :  { %251 = vmatpush1.msra.mxu1 %v145_v51 }
  0x2a   :  { %252 = vmatprep.subr.mxu1 %v208_v53 }
  0x2b   :  { %253 = vmatpush2.msra.mxu1 %v207_v55 }
  0x2c   :  { %254 = vmatprep.subr.mxu1 %v206_v57 }
  0x2d   :  { %21 = vsyncpa [#allocation3], 0  ;;  %255 = vmatpush2.msra.mxu1 %v205_v59  ;;  %v202_v1 = vld [vmem:[%s3248_s4 + $0x1c8] sm:$0xff]  ;;  %485 = vmatprep.subr.mxu0 %v442_v60  ;;  %v439_v2 = vld [vmem:[%s3252_s8 + $0x90] sm:$0xff]  ;;  %v2554_v48 = vsub.s32 0, %v2291_v22  ;;  %vm400_vm7 = vcmask 523264  }
  0x2e   :  { %256 = vmatprep.subr.mxu1 %v204_v61  ;;  %v201_v3 = vld [vmem:[%s3248_s4 + $0x1c0] sm:$0xff]  ;;  %486 = vmatpush1.msra.mxu0 %v441_v62  ;;  %v438_v4 = vld [vmem:[%s3252_s8 + $0x88] sm:$0xff]  ;;  %v200_v6 = vld [vmem:[%s3248_s4 + $0x1b8] sm:$0xff]  ;;  %vm1054_vm10 = vcmask 785408   ;;  %vm2133_vm13 = vmmov 0   ;;  %vm1552_vm14 = vcmask 16384  }
  0x2f   :  { %257 = vmatpush2.msra.mxu1 %v203_v63  ;;  %487 = vmatprep.subr.mxu0 %v440_v0  ;;  %v437_v7 = vld [vmem:[%s3252_s8 + $0x80] sm:$0xff]  ;;  %v199_v8 = vld [vmem:[%s3248_s4 + $0x1b0] sm:$0xff]  ;;  %v436_v9 = vld [vmem:[%s3252_s8 + $0x78] sm:$0xff]  ;;  %v213_v57 = vrot.slane %v2330_v35, %v2554_v48  ;;  %vm1569_vm15 = vcmask 1042432   ;;  %s2134_s27 = smov [#allocation2]  }
  0x30   :  { %258 = vmatprep.subr.mxu1 %v202_v1  ;;  %488 = vmatpush1.msra.mxu0 %v439_v2  ;;  %v198_v10 = vld [vmem:[%s3248_s4 + $0x1a8] sm:$0xff]  ;;  %v435_v11 = vld [vmem:[%s3252_s8 + $0x70] sm:$0xff]  ;;  %v197_v12 = vld [vmem:[%s3248_s4 + $0x1a0] sm:$0xff]  ;;  %s1750_s28 = sshll.u32 %s2134_s27, 4  ;;  %s1751_s28 = int_to_ptr.vmem [resolvable:$true] %s1750_s28 }
  0x31   :  { %259 = vmatpush2.msra.mxu1 %v201_v3  ;;  %489 = vmatprep.subr.mxu0 %v438_v4  ;;  %v434_v13 = vld [vmem:[%s3252_s8 + $0x68] sm:$0xff]  ;;  %v196_v14 = vld [vmem:[%s3248_s4 + $0x198] sm:$0xff]  ;;  %v433_v15 = vld [vmem:[%s3252_s8 + $0x60] sm:$0xff]  ;;  %p2115_p1 = scmp.lt.s32.totalorder %s1751_s28, %s1751_s28 }
  0x32   :  { %260 = vmatprep.subr.mxu1 %v200_v6  ;;  %490 = vmatpush1.msra.mxu0 %v437_v7  ;;  %v195_v16 = vld [vmem:[%s3248_s4 + $0x190] sm:$0xff]  ;;  %v432_v17 = vld [vmem:[%s3252_s8 + $0x58] sm:$0xff]  ;;  %v194_v18 = vld [vmem:[%s3248_s4 + $0x188] sm:$0xff] }
  0x33   :  { %261 = vmatpush2.msra.mxu1 %v199_v8  ;;  %491 = vmatprep.subr.mxu0 %v436_v9  ;;  %v431_v19 = vld [vmem:[%s3252_s8 + $0x50] sm:$0xff]  ;;  %v193_v20 = vld [vmem:[%s3248_s4 + $0x180] sm:$0xff]  ;;  %v430_v21 = vld [vmem:[%s3252_s8 + $0x48] sm:$0xff] }
  0x34   :  { %262 = vmatprep.subr.mxu1 %v198_v10  ;;  %492 = vmatpush1.msra.mxu0 %v435_v11  ;;  %v192_v23 = vld [vmem:[%s3248_s4 + $0x178] sm:$0xff]  ;;  %v429_v24 = vld [vmem:[%s3252_s8 + $0x40] sm:$0xff]  ;;  %v191_v25 = vld [vmem:[%s3248_s4 + $0x170] sm:$0xff] }
  0x35   :  { %263 = vmatpush2.msra.mxu1 %v197_v12  ;;  %493 = vmatprep.subr.mxu0 %v434_v13  ;;  %v428_v26 = vld [vmem:[%s3252_s8 + $0x38] sm:$0xff]  ;;  %v190_v27 = vld [vmem:[%s3248_s4 + $0x168] sm:$0xff]  ;;  %v427_v28 = vld [vmem:[%s3252_s8 + $0x30] sm:$0xff] }
  0x36   :  { %264 = vmatprep.subr.mxu1 %v196_v14  ;;  %494 = vmatpush1.msra.mxu0 %v433_v15  ;;  %v189_v30 = vld [vmem:[%s3248_s4 + $0x160] sm:$0xff]  ;;  %v426_v31 = vld [vmem:[%s3252_s8 + $0x28] sm:$0xff]  ;;  %v188_v32 = vld [vmem:[%s3248_s4 + $0x158] sm:$0xff] }
  0x37   :  { %265 = vmatpush2.msra.mxu1 %v195_v16  ;;  %495 = vmatprep.subr.mxu0 %v432_v17  ;;  %v425_v33 = vld [vmem:[%s3252_s8 + $0x20] sm:$0xff]  ;;  %v187_v34 = vld [vmem:[%s3248_s4 + $0x150] sm:$0xff]  ;;  %v424_v36 = vld [vmem:[%s3252_s8 + $0x18] sm:$0xff] }
  0x38   :  { %266 = vmatprep.subr.mxu1 %v194_v18  ;;  %496 = vmatpush1.msra.mxu0 %v431_v19  ;;  %v186_v37 = vld [vmem:[%s3248_s4 + $0x148] sm:$0xff]  ;;  %v423_v38 = vld [vmem:[%s3252_s8 + $0x10] sm:$0xff]  ;;  %v185_v39 = vld [vmem:[%s3248_s4 + $0x140] sm:$0xff] }
  0x39   :  { %267 = vmatpush2.msra.mxu1 %v193_v20  ;;  %497 = vmatprep.subr.mxu0 %v430_v21  ;;  %v422_v40 = vld [vmem:[%s3252_s8 + $0x8] sm:$0xff]  ;;  %v184_v41 = vld [vmem:[%s3248_s4 + $0x138] sm:$0xff]  ;;  %v421_v42 = vld [vmem:[%s3252_s8] sm:$0xff] }
  0x3a   :  { %268 = vmatprep.subr.mxu1 %v192_v23  ;;  %498 = vmatpush1.msra.mxu0 %v429_v24  ;;  %v183_v43 = vld [vmem:[%s3248_s4 + $0x130] sm:$0xff]  ;;  %v468_v44 = vld [vmem:[%s3252_s8 + $0x178] sm:$0xff]  ;;  %v182_v45 = vld [vmem:[%s3248_s4 + $0x128] sm:$0xff] }
  0x3b   :  { %269 = vmatpush2.msra.mxu1 %v191_v25  ;;  %499 = vmatprep.subr.mxu0 %v428_v26  ;;  %v467_v46 = vld [vmem:[%s3252_s8 + $0x170] sm:$0xff]  ;;  %v181_v47 = vld [vmem:[%s3248_s4 + $0x120] sm:$0xff]  ;;  %v466_v49 = vld [vmem:[%s3252_s8 + $0x168] sm:$0xff] }
  0x3c   :  { %270 = vmatprep.subr.mxu1 %v190_v27  ;;  %500 = vmatpush1.msra.mxu0 %v427_v28  ;;  %v180_v50 = vld [vmem:[%s3248_s4 + $0x118] sm:$0xff]  ;;  %v465_v51 = vld [vmem:[%s3252_s8 + $0x160] sm:$0xff]  ;;  %v179_v52 = vld [vmem:[%s3248_s4 + $0x110] sm:$0xff] }
  0x3d   :  { %271 = vmatpush2.msra.mxu1 %v189_v30  ;;  %501 = vmatprep.subr.mxu0 %v426_v31  ;;  %v464_v53 = vld [vmem:[%s3252_s8 + $0x158] sm:$0xff]  ;;  %v178_v54 = vld [vmem:[%s3248_s4 + $0x108] sm:$0xff]  ;;  %v463_v55 = vld [vmem:[%s3252_s8 + $0x150] sm:$0xff] }
  0x3e   :  { %272 = vmatprep.subr.mxu1 %v188_v32  ;;  %502 = vmatpush1.msra.mxu0 %v425_v33  ;;  %v177_v56 = vld [vmem:[%s3248_s4 + $0x100] sm:$0xff]  ;;  %v462_v58 = vld [vmem:[%s3252_s8 + $0x148] sm:$0xff]  ;;  %v460_v60 = vld [vmem:[%s3252_s8 + $0x138] sm:$0xff] }
  0x3f   :  { %273 = vmatpush2.msra.mxu1 %v187_v34  ;;  %503 = vmatprep.subr.mxu0 %v424_v36  ;;  %v461_v59 = vld [vmem:[%s3252_s8 + $0x140] sm:$0xff]  ;;  %v459_v35 = vld [vmem:[%s3252_s8 + $0x130] sm:$0xff]  ;;  %v458_v61 = vld [vmem:[%s3252_s8 + $0x128] sm:$0xff] }
  0x40   :  { %274 = vmatprep.subr.mxu1 %v186_v37  ;;  %504 = vmatpush1.msra.mxu0 %v423_v38  ;;  %v457_v62 = vld [vmem:[%s3252_s8 + $0x120] sm:$0xff]  ;;  %v456_v63 = vld [vmem:[%s3252_s8 + $0x118] sm:$0xff]  ;;  %v455_v0 = vld [vmem:[%s3252_s8 + $0x110] sm:$0xff] }
  0x41   :  { %275 = vmatpush2.msra.mxu1 %v185_v39  ;;  %505 = vmatprep.subr.mxu0 %v422_v40  ;;  %v454_v1 = vld [vmem:[%s3252_s8 + $0x108] sm:$0xff]  ;;  %v453_v2 = vld [vmem:[%s3252_s8 + $0x100] sm:$0xff]  ;;  %v391_v16 = vld [vmem:[%s3249_s5 + $0x18] sm:$0xff] }
  0x42   :  { %276 = vmatprep.subr.mxu1 %v184_v41  ;;  %506 = vmatpush1.msra.mxu0 %v421_v42  ;;  %v389_v15 = vld [vmem:[%s3249_s5 + $0x8] sm:$0xff]  ;;  %v388_v20 = vld [vmem:[%s3249_s5] sm:$0xff]  ;;  %vm395_vm3 = vcmp.gt.f32.partialorder %v391_v16, 0.0  ;;  %v390_v30 = vld [vmem:[%s3249_s5 + $0x10] sm:$0xff] }
  0x43   :  { %277 = vmatpush2.msra.mxu1 %v183_v43  ;;  %523 = vmatprep.subr.mxu0 %v468_v44  ;;  %vm393_vm2 = vcmp.gt.f32.partialorder %v389_v15, 0.0  ;;  %vm392_vm6 = vcmp.gt.f32.partialorder %v388_v20, 0.0  ;;  %vm394_vm9 = vcmp.gt.f32.partialorder %v390_v30, 0.0  ;;  %v595_v15 = vld [vmem:[%s3250_s6 + $0xb8] sm:$0xff]  ;;  %v1035_v16 = vld [vmem:[%s3254_s10 + $0x110] sm:$0xff] }
  0x44   :  { %278 = vmatprep.subr.mxu1 %v182_v45  ;;  %524 = vmatpush2.msra.mxu0 %v467_v46 }
  0x45   :  { %279 = vmatpush2.msra.mxu1 %v181_v47  ;;  %525 = vmatprep.subr.mxu0 %v466_v49 }
  0x46   :  { %280 = vmatprep.subr.mxu1 %v180_v50  ;;  %526 = vmatpush2.msra.mxu0 %v465_v51 }
  0x47   :  { %281 = vmatpush2.msra.mxu1 %v179_v52  ;;  %527 = vmatprep.subr.mxu0 %v464_v53 }
  0x48   :  { %282 = vmatprep.subr.mxu1 %v178_v54  ;;  %528 = vmatpush2.msra.mxu0 %v463_v55 }
  0x49   :  { %283 = vmatpush2.msra.mxu1 %v177_v56  ;;  %529 = vmatprep.subr.mxu0 %v462_v58  ;;  %v572_v56 = vld [vmem:[%s3250_s6] sm:$0xff]  ;;  %v574_v58 = vld [vmem:[%s3250_s6 + $0x10] sm:$0xff] }
  0x4a   :  { %285 = vmatmul.mubr.f32.vlgmr.msra.gmra.mxu1 %v213_v57  ;;  %530 = vmatpush2.msra.mxu0 %v461_v59  ;;  %v573_v57 = vld [vmem:[%s3250_s6 + $0x8] sm:$0xff]  ;;  %v575_v59 = vld [vmem:[%s3250_s6 + $0x18] sm:$0xff] }
  0x4b   :  { %531 = vmatprep.subr.mxu0 %v460_v60  ;;  %1125 = vmatprep.mubr.f32.mxu1 %v2132_v5  ;;  %v576_v60 = vld [vmem:[%s3250_s6 + $0x20] sm:$0xff] }
  0x4c   :  { %532 = vmatpush2.msra.mxu0 %v459_v35  ;;  %v577_v35 = vld [vmem:[%s3250_s6 + $0x28] sm:$0xff]  ;;  %1069 = vmatprep.subr.mxu1 %v1035_v16 }
  0x4d   :  { %533 = vmatprep.subr.mxu0 %v458_v61  ;;  %v578_v61 = vld [vmem:[%s3250_s6 + $0x30] sm:$0xff] }
  0x4e   :  { %534 = vmatpush2.msra.mxu0 %v457_v62  ;;  %v579_v62 = vld [vmem:[%s3250_s6 + $0x38] sm:$0xff] }
  0x4f   :  { %535 = vmatprep.subr.mxu0 %v456_v63  ;;  %v580_v63 = vld [vmem:[%s3250_s6 + $0x40] sm:$0xff] }
  0x50   :  { %536 = vmatpush2.msra.mxu0 %v455_v0  ;;  %v581_v0 = vld [vmem:[%s3250_s6 + $0x48] sm:$0xff] }
  0x51   :  { %537 = vmatprep.subr.mxu0 %v454_v1  ;;  %v582_v1 = vld [vmem:[%s3250_s6 + $0x50] sm:$0xff] }
  0x52   :  { %538 = vmatpush2.msra.mxu0 %v453_v2  ;;  %v583_v2 = vld [vmem:[%s3250_s6 + $0x58] sm:$0xff] }
  0xca   :  { %v2613_v3 = vpop.f32.mrf.mxu1 }
  0xcb   :  { %1928 = vmatprep.subr.mxu0 %v2613_v3 }
  0xcc   :  { %v2616_v7 = vpop.f32.mrf.mxu1 }
  0xcf   :  { %v365_v4 = vpop.f32.mrf.mxu0 }
  0xd1   :  { %v367_v6 = vpop.f32.mrf.mxu0 }
  0xd3   :  { %v371_v8 = vpop.f32.mrf.mxu0 }
  0xd5   :  { %v373_v12 = vpop.f32.mrf.mxu0 }
 0x10a   :  { %v286_v9 = vpop.f32.mrf.mxu1 }
 0x10b   :  { %v294_v10 = vrot.slane %v286_v9, %v2554_v48  ;;  %v589_v9 = vld [vmem:[%s3250_s6 + $0x88] sm:$0xff] }
 0x10c   :  { %v288_v11 = vpop.f32.mrf.mxu1 }
 0x10d   :  { %v366_v13 = vadd.f32 %v365_v4, %v294_v10  ;;  %v298_v14 = vrot.slane %v288_v11, %v2554_v48  ;;  %v372_v17 = vadd.f32 %v371_v8, %v294_v10  ;;  %v585_v4 = vld [vmem:[%s3250_s6 + $0x68] sm:$0xff]  ;;  %v588_v8 = vld [vmem:[%s3250_s6 + $0x80] sm:$0xff]  ;;  %v590_v10 = vld [vmem:[%s3250_s6 + $0x90] sm:$0xff] }
 0x10e   :  { %v591_v11 = vld [vmem:[%s3250_s6 + $0x98] sm:$0xff] }
 0x10f   :  { %v368_v18 = vadd.f32 %v367_v6, %v298_v14  ;;  %v374_v19 = vadd.f32 %v373_v12, %v298_v14  ;;  %vm376_vm1 = vcmp.gt.f32.partialorder %v366_v13, 0.0  ;;  %v380_v21 = vmul.f32 0.2, %v366_v13  ;;  %v586_v6 = vld [vmem:[%s3250_s6 + $0x70] sm:$0xff]  ;;  %v592_v12 = vld [vmem:[%s3250_s6 + $0xa0] sm:$0xff] }
 0x110   :  { %v382_v25 = vmul.f32 0.2, %v372_v17  ;;  %vm378_vm8 = vcmp.gt.f32.partialorder %v372_v17, 0.0  ;;  %v594_v14 = vld [vmem:[%s3250_s6 + $0xb0] sm:$0xff] }
 0x111   :  { %v381_v23 = vmul.f32 0.2, %v368_v18  ;;  %vm379_vm4 = vcmp.gt.f32.partialorder %v374_v19, 0.0  ;;  %v383_v24 = vmul.f32 0.2, %v374_v19  ;;  %vm377_vm5 = vcmp.gt.f32.partialorder %v368_v18, 0.0 }
 0x112   :  { %v384_v26 = vsel %vm376_vm1, %v366_v13, %v380_v21  ;;  %v386_v37 = vsel %vm378_vm8, %v372_v17, %v382_v25  ;;  %v593_v13 = vld [vmem:[%s3250_s6 + $0xa8] sm:$0xff]  ;;  %vm1742_vm1 = vcmask 261120  }
 0x113   :  { %v385_v27 = vsel %vm377_vm5, %v368_v18, %v381_v23  ;;  %v387_v28 = vsel %vm379_vm4, %v374_v19, %v383_v24  ;;  %v396_v33 = vsel %vm392_vm6, %v384_v26, -1e+30  ;;  %v398_v39 = vsel %vm394_vm9, %v386_v37, -1e+30 }
 0x114   :  { %v397_v31 = vsel %vm393_vm2, %v385_v27, -1e+30  ;;  %v399_v32 = vsel %vm395_vm3, %v387_v28, -1e+30 }
 0x115   :  { %v401_v34 = vsel %vm400_vm7, %v397_v31, -inf  ;;  %v405_v38 = vsel %vm400_vm7, %v399_v32, -inf }
 0x116   :  { %v402_v36 = vmax.f32 %v396_v33, %v401_v34  ;;  %v406_v40 = vmax.f32 %v398_v39, %v405_v38 }
 0x118   :  { %403 = vmax.xlane.f32.xlu0 %v402_v36 }
 0x11c   :  { %407 = vmax.xlane.f32.xlu0 %v406_v40 }
 0x1a1   :  { %v404_v41 = vpop.xlane.xlu0 %403 }
 0x1a2   :  { %v409_v42 = vsub.f32 %v396_v33, %v404_v41  ;;  %v410_v43 = vsub.f32 %v397_v31, %v404_v41 }
 0x1a4   :  { %v413_v44 = vmul.f32 1.442695, %v409_v42  ;;  %v415_v45 = vmul.f32 1.442695, %v410_v43  ;;  %v868_v43 = vld [vmem:[%s3251_s7 + $0x78] sm:$0xff] }
 0x1a5   :  { %v408_v46 = vpop.xlane.xlu0 %407 }
 0x1a6   :  { %2074 = vpow2.f32 %v413_v44  ;;  %v411_v47 = vsub.f32 %v398_v39, %v408_v46  ;;  %v412_v49 = vsub.f32 %v399_v32, %v408_v46 }
 0x1a7   :  { %2076 = vpow2.f32 %v415_v45  ;;  %v867_v45 = vld [vmem:[%s3251_s7 + $0x70] sm:$0xff] }
 0x1a8   :  { %v417_v50 = vmul.f32 1.442695, %v411_v47  ;;  %v419_v51 = vmul.f32 1.442695, %v412_v49  ;;  %v866_v47 = vld [vmem:[%s3251_s7 + $0x68] sm:$0xff] }
 0x1aa   :  { %2078 = vpow2.f32 %v417_v50 }
 0x1ab   :  { %2080 = vpow2.f32 %v419_v51  ;;  %v865_v51 = vld [vmem:[%s3251_s7 + $0x60] sm:$0xff] }
 0x1b3   :  { %v2634_v52 = vpop.eup %2074 }
 0x1b4   :  { %v2636_v53 = vpop.eup %2076 }
 0x1b5   :  { %1765 = vmatprep.mubr.msk.f32.mxu0 %vm400_vm7, %v2636_v53 }
 0x1b6   :  { %540 = vmatmul.mubr.f32.vlgmr.msra.gmra.mxu0 %v2634_v52 }
 0x1b7   :  { %v2641_v54 = vpop.eup %2078  ;;  %1929 = vmatpush3.msra.mxu0 %v2613_v3  ;;  %v584_v3 = vld [vmem:[%s3250_s6 + $0x60] sm:$0xff] }
 0x1b8   :  { %v2644_v55 = vpop.eup %2080  ;;  %1930 = vmatprep.subr.mxu0 %v2616_v7 }
 0x1b9   :  { %1931 = vmatpush3.msra.mxu0 %v2616_v7  ;;  %1766 = vmatprep.mubr.msk.f32.mxu0 %vm400_vm7, %v2644_v55  ;;  %v587_v7 = vld [vmem:[%s3250_s6 + $0x78] sm:$0xff] }
 0x1ba   :  { %546 = vmatmul.mubr.f32.gmra.mxu0 %v2641_v54  ;;  %914 = vmatprep.subr.mxu0 %v2132_v5 }
 0x1bb   :  { %1932 = vmatprep.mubr.msk.f32.mxu0 %vm58_vm0, %v572_v56 }
 0x1be   :  { %1933 = vmatmul.mubr.msk.f32.vlgmr.msra.gmra.mxu0 %vm58_vm0, %v573_v57  ;;  %v864_v57 = vld [vmem:[%s3251_s7 + $0x58] sm:$0xff] }
 0x1bf   :  { %1935 = vmatprep.mubr.msk.f32.mxu0 %vm58_vm0, %v574_v58 }
 0x1c2   :  { %1936 = vmatmul.mubr.msk.f32.gmra.mxu0 %vm58_vm0, %v575_v59  ;;  %v863_v59 = vld [vmem:[%s3251_s7 + $0x50] sm:$0xff] }
 0x1c3   :  { %1938 = vmatprep.mubr.msk.f32.mxu0 %vm58_vm0, %v576_v60 }
 0x1c6   :  { %1939 = vmatmul.mubr.msk.f32.gmra.mxu0 %vm58_vm0, %v577_v35 }
 0x1c7   :  { %1941 = vmatprep.mubr.msk.f32.mxu0 %vm58_vm0, %v578_v61  ;;  %v862_v61 = vld [vmem:[%s3251_s7 + $0x48] sm:$0xff] }
 0x1ca   :  { %1942 = vmatmul.mubr.msk.f32.gmra.mxu0 %vm58_vm0, %v579_v62 }
 0x1cb   :  { %1944 = vmatprep.mubr.msk.f32.mxu0 %vm58_vm0, %v580_v63  ;;  %v861_v63 = vld [vmem:[%s3251_s7 + $0x40] sm:$0xff] }
 0x1ce   :  { %1945 = vmatmul.mubr.msk.f32.gmra.mxu0 %vm58_vm0, %v581_v0 }
 0x1cf   :  { %1947 = vmatprep.mubr.msk.f32.mxu0 %vm58_vm0, %v582_v1 }
 0x1d2   :  { %1948 = vmatmul.mubr.msk.f32.gmra.mxu0 %vm58_vm0, %v583_v2  ;;  %v860_v2 = vld [vmem:[%s3251_s7 + $0x38] sm:$0xff] }
 0x1d3   :  { %1950 = vmatprep.mubr.msk.f32.mxu0 %vm58_vm0, %v584_v3 }
 0x1d6   :  { %1951 = vmatmul.mubr.msk.f32.gmra.mxu0 %vm58_vm0, %v585_v4  ;;  %v859_v4 = vld [vmem:[%s3251_s7 + $0x30] sm:$0xff] }
 0x1d7   :  { %1953 = vmatprep.mubr.msk.f32.mxu0 %vm58_vm0, %v586_v6 }
 0x1da   :  { %1954 = vmatmul.mubr.msk.f32.gmra.mxu0 %vm58_vm0, %v587_v7 }
 0x1db   :  { %1956 = vmatprep.mubr.msk.f32.mxu0 %vm58_vm0, %v588_v8  ;;  %v858_v8 = vld [vmem:[%s3251_s7 + $0x28] sm:$0xff] }
 0x1de   :  { %1957 = vmatmul.mubr.msk.f32.gmra.mxu0 %vm58_vm0, %v589_v9 }
 0x1df   :  { %1959 = vmatprep.mubr.msk.f32.mxu0 %vm58_vm0, %v590_v10  ;;  %v857_v10 = vld [vmem:[%s3251_s7 + $0x20] sm:$0xff] }
 0x1e2   :  { %1960 = vmatmul.mubr.msk.f32.gmra.mxu0 %vm58_vm0, %v591_v11 }
 0x1e3   :  { %1962 = vmatprep.mubr.msk.f32.mxu0 %vm58_vm0, %v592_v12 }
 0x1e6   :  { %1963 = vmatmul.mubr.msk.f32.gmra.mxu0 %vm58_vm0, %v593_v13  ;;  %v856_v13 = vld [vmem:[%s3251_s7 + $0x18] sm:$0xff] }
 0x1e7   :  { %1965 = vmatprep.mubr.msk.f32.mxu0 %vm58_vm0, %v594_v14 }
 0x1ea   :  { %1966 = vmatmul.mubr.msk.f32.gmra.mxu0 %vm58_vm0, %v595_v15  ;;  %v855_v15 = vld [vmem:[%s3251_s7 + $0x10] sm:$0xff] }
 0x276   :  { %v2751_v17 = vpop.f32.mrf.mxu0 }
 0x278   :  { %v543_v18 = vpop.f32.mrf.mxu0 }
 0x279   :  { %2082 = vrcp.f32 %v543_v18 }
 0x27a   :  { %v2753_v19 = vpop.f32.mrf.mxu0  ;;  %2084 = vrcp.f32 %v2751_v17 }
 0x27c   :  { %v2755_v20 = vpop.f32.mrf.mxu0 }
 0x27d   :  { %2086 = vrcp.f32 %v2755_v20 }
 0x27e   :  { %v2757_v21 = vpop.f32.mrf.mxu0  ;;  %2088 = vrcp.f32 %v2753_v19 }
 0x280   :  { %v2759_v23 = vpop.f32.mrf.mxu0 }
 0x282   :  { %v2761_v24 = vpop.f32.mrf.mxu0 }
 0x284   :  { %v2763_v25 = vpop.f32.mrf.mxu0 }
 0x286   :  { %v2083_v26 = vpop.eup %2082  ;;  %v2765_v27 = vpop.f32.mrf.mxu0 }
 0x287   :  { %v557_v28 = vmul.f32 %v2083_v26, %v543_v18  ;;  %v882_v12 = vmul.f32 %v2765_v27, %v858_v8  ;;  %v880_v18 = vmul.f32 %v2761_v24, %v856_v13  ;;  %v879_v27 = vmul.f32 %v855_v15, %v2763_v25  ;;  %v876_v24 = vld [vmem:[%s3251_s7 + $0xb8] sm:$0xff]  ;;  %v1005_v15 = vld [vmem:[%s3254_s10 + $0x20] sm:$0xff] }
 0x288   :  { %v2767_v30 = vpop.f32.mrf.mxu0  ;;  %v1016_v8 = vld [vmem:[%s3254_s10 + $0x78] sm:$0xff] }
 0x289   :  { %v561_v31 = vsub.f32 2.0, %v557_v28  ;;  %v881_v14 = vmul.f32 %v857_v10, %v2767_v30  ;;  %v853_v28 = vld [vmem:[%s3251_s7] sm:$0xff]  ;;  %v1008_v13 = vld [vmem:[%s3254_s10 + $0x38] sm:$0xff] }
 0x28a   :  { %v1943_v32 = vpop.f32.mrf.mxu0  ;;  %v1013_v10 = vld [vmem:[%s3254_s10 + $0x60] sm:$0xff] }
 0x28b   :  { %v565_v33 = vmul.f32 %v2083_v26, %v561_v31  ;;  %v884_v7 = vmul.f32 %v1943_v32, %v860_v2  ;;  %v854_v26 = vld [vmem:[%s3251_s7 + $0x8] sm:$0xff]  ;;  %v877_v32 = vmul.f32 %v853_v28, %v2759_v23  ;;  %v1023_v2 = vld [vmem:[%s3254_s10 + $0xb0] sm:$0xff]  ;;  %v1791_v28 = vld [vmem:[%s3253_s9] ss:$0 sm:$0xff] }
 0x28c   :  { %v764_v34 = vpop.f32.mrf.mxu0  ;;  %v878_v31 = vmul.f32 %v2757_v21, %v854_v26  ;;  %v874_v21 = vld [vmem:[%s3251_s7 + $0xa8] sm:$0xff]  ;;  %v1001_v26 = vld [vmem:[%s3254_s10] sm:$0xff] }
 0x28d   :  { %v569_v36 = vmul.f32 %v2636_v53, %v565_v33  ;;  %v883_v9 = vmul.f32 %v859_v4, %v764_v34  ;;  %v875_v34 = vld [vmem:[%s3251_s7 + $0xb0] sm:$0xff]  ;;  %v1020_v4 = vld [vmem:[%s3254_s10 + $0x98] sm:$0xff] }
 0x28e   :  { %v1946_v37 = vpop.f32.mrf.mxu0 }
 0x28f   :  { %1792 = vmatprep.mubr.msk.f32.mxu0 %vm400_vm7, %v569_v36  ;;  %v886_v1 = vmul.f32 %v1946_v37, %v862_v61  ;;  %v2085_v36 = vpop.eup %2084 }
 0x290   :  { %v774_v38 = vpop.f32.mrf.mxu0  ;;  %v2087_v37 = vpop.eup %2086  ;;  %v556_v23 = vmul.f32 %v2085_v36, %v2751_v17 }
 0x291   :  { %v885_v3 = vmul.f32 %v861_v63, %v774_v38  ;;  %v1028_v63 = vld [vmem:[%s3254_s10 + $0xd8] sm:$0xff] }
 0x292   :  { %v1949_v39 = vpop.f32.mrf.mxu0  ;;  %v560_v17 = vsub.f32 2.0, %v556_v23 }
 0x293   :  { %v888_v35 = vmul.f32 %v1949_v39, %v864_v57  ;;  %v873_v39 = vld [vmem:[%s3251_s7 + $0xa0] sm:$0xff] }
 0x294   :  { %v784_v40 = vpop.f32.mrf.mxu0 }
 0x295   :  { %v887_v62 = vmul.f32 %v863_v59, %v784_v40  ;;  %v2089_v40 = vpop.eup %2088 }
 0x296   :  { %v1952_v41 = vpop.f32.mrf.mxu0 }
 0x297   :  { %v890_v56 = vmul.f32 %v1952_v41, %v866_v47  ;;  %v559_v41 = vmul.f32 %v2087_v37, %v2755_v20 }
 0x298   :  { %v794_v42 = vpop.f32.mrf.mxu0 }
 0x299   :  { %v889_v58 = vmul.f32 %v865_v51, %v794_v42  ;;  %v563_v20 = vsub.f32 2.0, %v559_v41 }
 0x29a   :  { %v1955_v44 = vpop.f32.mrf.mxu0 }
 0x29b   :  { %v892_v46 = vmul.f32 %v1955_v44, %v868_v43  ;;  %v872_v43 = vld [vmem:[%s3251_s7 + $0x98] sm:$0xff]  ;;  %v567_v57 = vmul.f32 %v2087_v37, %v563_v20  ;;  %v1018_v20 = vld [vmem:[%s3254_s10 + $0x88] sm:$0xff] }
 0x29c   :  { %v804_v49 = vpop.f32.mrf.mxu0 }
 0x29d   :  { %v891_v50 = vmul.f32 %v867_v45, %v804_v49  ;;  %915 = vmatpush1.msra.mxu0 %v892_v46  ;;  %v558_v45 = vmul.f32 %v2089_v40, %v2753_v19  ;;  %v871_v46 = vld [vmem:[%s3251_s7 + $0x90] sm:$0xff]  ;;  %v870_v49 = vld [vmem:[%s3251_s7 + $0x88] sm:$0xff]  ;;  %v564_v19 = vmul.f32 %v2085_v36, %v560_v17 }
 0x29e   :  { %916 = vmatprep.subr.mxu0 %v2132_v5  ;;  %v2784_v53 = vpop.f32.mrf.mxu0  ;;  %v1027_v17 = vld [vmem:[%s3254_s10 + $0xd0] sm:$0xff] }
 0x29f   :  { %917 = vmatpush1.msra.mxu0 %v891_v50  ;;  %v562_v51 = vsub.f32 2.0, %v558_v45  ;;  %v1024_v45 = vld [vmem:[%s3254_s10 + $0xb8] sm:$0xff] }
 0x2a0   :  { %918 = vmatprep.subr.mxu0 %v2132_v5  ;;  %v2794_v60 = vpop.f32.mrf.mxu0 }
 0x2a1   :  { %919 = vmatpush1.msra.mxu0 %v890_v56  ;;  %v869_v56 = vld [vmem:[%s3251_s7 + $0x80] sm:$0xff]  ;;  %v566_v61 = vmul.f32 %v2089_v40, %v562_v51  ;;  %v1003_v51 = vld [vmem:[%s3254_s10 + $0x10] sm:$0xff] }
 0x2a2   :  { %920 = vmatprep.subr.mxu0 %v2132_v5  ;;  %v2804_v0 = vpop.f32.mrf.mxu0  ;;  %v893_v59 = vmul.f32 %v869_v56, %v2794_v60  ;;  %v1034_v60 = vld [vmem:[%s3254_s10 + $0x108] sm:$0xff]  ;;  %v1033_v40 = vld [vmem:[%s3254_s10 + $0x100] sm:$0xff]  ;;  %v1411_v56 = vld [vmem:[%s3256_s12 + $0x178] sm:$0xff] }
 0x2a3   :  { %921 = vmatpush1.msra.mxu0 %v889_v58  ;;  %v896_v47 = vmul.f32 %v2804_v0, %v872_v43  ;;  %v894_v58 = vmul.f32 %v2784_v53, %v870_v49  ;;  %v570_v53 = vmul.f32 %v2641_v54, %v566_v61  ;;  %1070 = vmatpush1.msra.mxu1 %v1034_v60  ;;  %v1029_v54 = vld [vmem:[%s3254_s10 + $0xe0] sm:$0xff]  ;;  %v1026_v0 = vld [vmem:[%s3254_s10 + $0xc8] sm:$0xff]  ;;  %v1012_v49 = vld [vmem:[%s3254_s10 + $0x58] sm:$0xff] }
 0x2a4   :  { %922 = vmatprep.subr.mxu0 %v2132_v5  ;;  %v2814_v6 = vpop.f32.mrf.mxu0  ;;  %v1406_v61 = vld [vmem:[%s3256_s12 + $0x150] sm:$0xff]  ;;  %v1403_v60 = vld [vmem:[%s3256_s12 + $0x138] sm:$0xff] }
 0x2a5   :  { %923 = vmatpush1.msra.mxu0 %v888_v35  ;;  %v895_v50 = vmul.f32 %v871_v46, %v2814_v6  ;;  %v568_v35 = vmul.f32 %v2634_v52, %v564_v19  ;;  %v1032_v52 = vld [vmem:[%s3254_s10 + $0xf8] sm:$0xff]  ;;  %v1019_v6 = vld [vmem:[%s3254_s10 + $0x90] sm:$0xff]  ;;  %v1021_v46 = vld [vmem:[%s3254_s10 + $0xa0] sm:$0xff] }
 0x2a6   :  { %924 = vmatprep.subr.mxu0 %v2132_v5  ;;  %v1964_v11 = vpop.f32.mrf.mxu0  ;;  %1071 = vmatprep.subr.mxu1 %v1032_v52  ;;  %v1006_v19 = vld [vmem:[%s3254_s10 + $0x28] sm:$0xff]  ;;  %v1402_v52 = vld [vmem:[%s3256_s12 + $0x130] sm:$0xff] }
 0x2a7   :  { %925 = vmatpush1.msra.mxu0 %v887_v62  ;;  %v898_v42 = vmul.f32 %v1964_v11, %v874_v21  ;;  %v571_v62 = vmul.f32 %v2644_v55, %v567_v57  ;;  %v1031_v55 = vld [vmem:[%s3254_s10 + $0xf0] sm:$0xff] }
 0x2a8   :  { %926 = vmatprep.subr.mxu0 %v2132_v5  ;;  %v834_v16 = vpop.f32.mrf.mxu0  ;;  %1072 = vmatpush1.msra.mxu1 %v1031_v55  ;;  %v1011_v11 = vld [vmem:[%s3254_s10 + $0x50] sm:$0xff] }
 0x2a9   :  { %927 = vmatpush1.msra.mxu0 %v886_v1  ;;  %v897_v44 = vmul.f32 %v873_v39, %v834_v16  ;;  %1073 = vmatprep.subr.mxu1 %v1029_v54  ;;  %v1025_v1 = vld [vmem:[%s3254_s10 + $0xc0] sm:$0xff]  ;;  %v1004_v16 = vld [vmem:[%s3254_s10 + $0x18] sm:$0xff]  ;;  %v1410_v57 = vld [vmem:[%s3256_s12 + $0x170] sm:$0xff] }
 0x2aa   :  { %928 = vmatprep.subr.mxu0 %v2132_v5  ;;  %v1967_v30 = vpop.f32.mrf.mxu0  ;;  %1074 = vmatpush1.msra.mxu1 %v1028_v63  ;;  %v1037_v54 = vld [vmem:[%s3255_s11] sm:$0x7] }
 0x2ab   :  { %929 = vmatpush1.msra.mxu0 %v885_v3  ;;  %v900_v25 = vmul.f32 %v1967_v30, %v876_v24  ;;  %1075 = vmatprep.subr.mxu1 %v1026_v0  ;;  %v1022_v3 = vld [vmem:[%s3254_s10 + $0xa8] sm:$0xff]  ;;  %v1046_v0 = vrot.slane %v1037_v54, %v216_v29 }
 0x2ac   :  { %930 = vmatprep.subr.mxu0 %v2132_v5  ;;  %v844_v33 = vpop.f32.mrf.mxu0  ;;  %1076 = vmatpush1.msra.mxu1 %v1025_v1  ;;  %v1042_v1 = vrot.slane %v1037_v54, %v2554_v48 }
 0x2ad   :  { %931 = vmatpush1.msra.mxu0 %v884_v7  ;;  %v899_v38 = vmul.f32 %v875_v34, %v844_v33  ;;  %1077 = vmatprep.subr.mxu1 %v1023_v2  ;;  %v1017_v7 = vld [vmem:[%s3254_s10 + $0x80] sm:$0xff] }
 0x2ae   :  { %932 = vmatprep.subr.mxu0 %v2132_v5  ;;  %1078 = vmatpush1.msra.mxu1 %v1022_v3 }
 0x2af   :  { %933 = vmatpush1.msra.mxu0 %v883_v9  ;;  %1079 = vmatprep.subr.mxu1 %v1020_v4  ;;  %v1014_v9 = vld [vmem:[%s3254_s10 + $0x68] sm:$0xff] }
 0x2b0   :  { %934 = vmatprep.subr.mxu0 %v2132_v5  ;;  %1080 = vmatpush1.msra.mxu1 %v1019_v6 }
 0x2b1   :  { %935 = vmatpush1.msra.mxu0 %v882_v12  ;;  %1081 = vmatprep.subr.mxu1 %v1017_v7  ;;  %v1010_v12 = vld [vmem:[%s3254_s10 + $0x48] sm:$0xff] }
 0x2b2   :  { %936 = vmatprep.subr.mxu0 %v2132_v5  ;;  %1082 = vmatpush1.msra.mxu1 %v1016_v8 }
 0x2b3   :  { %937 = vmatpush1.msra.mxu0 %v881_v14  ;;  %1083 = vmatprep.subr.mxu1 %v1014_v9  ;;  %v1007_v14 = vld [vmem:[%s3254_s10 + $0x30] sm:$0xff]  ;;  %v1049_v9 = vsub.s32 2, %v2291_v22 }
 0x2b4   :  { %938 = vmatprep.subr.mxu0 %v2132_v5  ;;  %1084 = vmatpush1.msra.mxu1 %v1013_v10 }
 0x2b5   :  { %939 = vmatpush1.msra.mxu0 %v880_v18  ;;  %1085 = vmatprep.subr.mxu1 %v1011_v11  ;;  %v1002_v18 = vld [vmem:[%s3254_s10 + $0x8] sm:$0xff]  ;;  %v1050_v10 = vrot.slane %v1037_v54, %v1049_v9  ;;  %v1396_v54 = vld [vmem:[%s3256_s12 + $0x100] sm:$0xff] }
 0x2b6   :  { %940 = vmatprep.subr.mxu0 %v2132_v5  ;;  %1086 = vmatpush1.msra.mxu1 %v1010_v12 }
 0x2b7   :  { %941 = vmatpush1.msra.mxu0 %v879_v27  ;;  %1087 = vmatprep.subr.mxu1 %v1008_v13  ;;  %v1036_v27 = vld [vmem:[%s3254_s10 + $0x118] sm:$0xff] }
 0x2b8   :  { %942 = vmatprep.subr.mxu0 %v2132_v5  ;;  %1088 = vmatpush1.msra.mxu1 %v1007_v14  ;;  %v1219_v14 = vld [vmem:[%s3257_s13] sm:$0x1] }
 0x2b9   :  { %943 = vmatpush1.msra.mxu0 %v878_v31  ;;  %1089 = vmatprep.subr.mxu1 %v1005_v15 }
 0x2ba   :  { %944 = vmatprep.subr.mxu0 %v2132_v5  ;;  %1090 = vmatpush1.msra.mxu1 %v1004_v16 }
 0x2bb   :  { %945 = vmatpush1.msra.mxu0 %v877_v32  ;;  %1091 = vmatprep.subr.mxu1 %v1002_v18 }
 0x2bc   :  { %962 = vmatprep.subr.mxu0 %v2132_v5  ;;  %1092 = vmatpush1.msra.mxu1 %v1001_v26 }
 0x2bd   :  { %963 = vmatpush2.msra.mxu0 %v900_v25  ;;  %1968 = vmatprep.subr.mxu1 %v1036_v27 }
 0x2be   :  { %964 = vmatprep.subr.mxu0 %v2132_v5 }
 0x2bf   :  { %965 = vmatpush2.msra.mxu0 %v899_v38 }
 0x2c0   :  { %966 = vmatprep.subr.mxu0 %v2132_v5 }
 0x2c1   :  { %967 = vmatpush2.msra.mxu0 %v898_v42  ;;  %v1030_v42 = vld [vmem:[%s3254_s10 + $0xe8] sm:$0xff] }
 0x2c2   :  { %968 = vmatprep.subr.mxu0 %v2132_v5 }
 0x2c3   :  { %969 = vmatpush2.msra.mxu0 %v897_v44 }
 0x2c4   :  { %970 = vmatprep.subr.mxu0 %v2132_v5 }
 0x2c5   :  { %971 = vmatpush2.msra.mxu0 %v896_v47  ;;  %v1015_v47 = vld [vmem:[%s3254_s10 + $0x70] sm:$0xff] }
 0x2c6   :  { %972 = vmatprep.subr.mxu0 %v2132_v5 }
 0x2c7   :  { %973 = vmatpush2.msra.mxu0 %v895_v50  ;;  %v1009_v50 = vld [vmem:[%s3254_s10 + $0x40] sm:$0xff] }
 0x2c8   :  { %974 = vmatprep.subr.mxu0 %v2132_v5 }
 0x2c9   :  { %975 = vmatpush2.msra.mxu0 %v894_v58  ;;  %v1409_v58 = vld [vmem:[%s3256_s12 + $0x168] sm:$0xff] }
 0x2ca   :  { %976 = vmatprep.subr.mxu0 %v2132_v5 }
 0x2cb   :  { %977 = vmatpush2.msra.mxu0 %v893_v59  ;;  %v1408_v59 = vld [vmem:[%s3256_s12 + $0x160] sm:$0xff] }
 0x2cc   :  { %979 = vmatmul.mubr.f32.vlgmr.msra.gmra.mxu0 %v568_v35  ;;  %2002 = vmatprep.subr.mxu0 %v2132_v5  ;;  %v1407_v35 = vld [vmem:[%s3256_s12 + $0x158] sm:$0xff] }
 0x2cd   :  { %1793 = vmatprep.mubr.msk.f32.mxu0 %vm400_vm7, %v571_v62  ;;  %2003 = vmatpush3.msra.mxu0 %v1411_v56  ;;  %v1405_v62 = vld [vmem:[%s3256_s12 + $0x148] sm:$0xff]  ;;  %v1382_v56 = vld [vmem:[%s3256_s12 + $0x90] sm:$0xff] }
 0x2ce   :  { %2004 = vmatprep.subr.mxu0 %v2132_v5 }
 0x2cf   :  { %2005 = vmatpush3.msra.mxu0 %v1410_v57  ;;  %v1366_v57 = vld [vmem:[%s3256_s12 + $0x10] sm:$0xff] }
 0x2d0   :  { %984 = vmatmul.mubr.f32.gmra.mxu0 %v570_v53  ;;  %2006 = vmatprep.subr.mxu0 %v2132_v5  ;;  %v1404_v53 = vld [vmem:[%s3256_s12 + $0x140] sm:$0xff] }
 0x2d1   :  { %2034 = vmatprep.mubr.msk.f32.mxu0 %vm2133_vm13, %v2132_v5  ;;  %2007 = vmatpush3.msra.mxu0 %v1409_v58  ;;  %v1381_v58 = vld [vmem:[%s3256_s12 + $0x88] sm:$0xff] }
 0x2d2   :  { %2008 = vmatprep.subr.mxu0 %v2132_v5 }
 0x2d3   :  { %2009 = vmatpush3.msra.mxu0 %v1408_v59  ;;  %v1365_v59 = vld [vmem:[%s3256_s12 + $0x8] sm:$0xff] }
 0x2d4   :  { %2010 = vmatprep.subr.mxu0 %v2132_v5 }
 0x2d5   :  { %2011 = vmatpush3.msra.mxu0 %v1407_v35  ;;  %v1401_v35 = vld [vmem:[%s3256_s12 + $0x128] sm:$0xff] }
 0x2d6   :  { %2012 = vmatprep.subr.mxu0 %v2132_v5 }
 0x2d7   :  { %2013 = vmatpush3.msra.mxu0 %v1406_v61  ;;  %v1380_v61 = vld [vmem:[%s3256_s12 + $0x80] sm:$0xff] }
 0x2d8   :  { %2014 = vmatprep.subr.mxu0 %v2132_v5 }
 0x2d9   :  { %2015 = vmatpush3.msra.mxu0 %v1405_v62  ;;  %v1364_v62 = vld [vmem:[%s3256_s12] sm:$0xff] }
 0x2da   :  { %2016 = vmatprep.subr.mxu0 %v2132_v5 }
 0x2db   :  { %2017 = vmatpush3.msra.mxu0 %v1404_v53  ;;  %v1400_v53 = vld [vmem:[%s3256_s12 + $0x120] sm:$0xff] }
 0x2dc   :  { %2018 = vmatprep.subr.mxu0 %v2132_v5 }
 0x2dd   :  { %2019 = vmatpush3.msra.mxu0 %v1403_v60  ;;  %v1399_v60 = vld [vmem:[%s3256_s12 + $0x118] sm:$0xff] }
 0x2de   :  { %2020 = vmatprep.subr.mxu0 %v2132_v5 }
 0x2df   :  { %2021 = vmatpush3.msra.mxu0 %v1402_v52  ;;  %v1398_v52 = vld [vmem:[%s3256_s12 + $0x110] sm:$0xff] }
 0x2e0   :  { %2022 = vmatprep.subr.mxu0 %v2132_v5 }
 0x2e1   :  { %2023 = vmatpush3.msra.mxu0 %v1401_v35 }
 0x2e2   :  { %2024 = vmatprep.subr.mxu0 %v2132_v5 }
 0x2e3   :  { %2025 = vmatpush3.msra.mxu0 %v1400_v53 }
 0x2e4   :  { %2026 = vmatprep.subr.mxu0 %v2132_v5 }
 0x2e5   :  { %2027 = vmatpush3.msra.mxu0 %v1399_v60 }
 0x2e6   :  { %2028 = vmatprep.subr.mxu0 %v2132_v5 }
 0x2e7   :  { %2029 = vmatpush3.msra.mxu0 %v1398_v52 }
 0x2e8   :  { %2030 = vmatprep.subr.mxu0 %v2132_v5 }
 0x38c   :  { %v980_v30 = vpop.f32.mrf.mxu0 }
 0x38d   :  { %v981_v24 = vadd.f32 %v1791_v28, %v980_v30  ;;  %v1379_v30 = vld [vmem:[%s3256_s12 + $0x78] sm:$0xff] }
 0x38e   :  { %v982_v31 = vpop.f32.mrf.mxu0 }
 0x38f   :  { %v991_v32 = vmin.f32 %v981_v24, 0.0  ;;  %vm989_vm11 = vcmp.gt.f32.partialorder %v981_v24, 0.0  ;;  %v1378_v31 = vld [vmem:[%s3256_s12 + $0x70] sm:$0xff] }
 0x390   :  { %v985_v25 = vpop.f32.mrf.mxu0 }
 0x391   :  { %v993_v33 = vmul.f32 1.442695, %v991_v32  ;;  %v986_v34 = vadd.f32 %v1791_v28, %v985_v25  ;;  %v1393_v32 = vld [vmem:[%s3256_s12 + $0xe8] sm:$0xff] }
 0x392   :  { %v987_v36 = vpop.f32.mrf.mxu0  ;;  %v1377_v25 = vld [vmem:[%s3256_s12 + $0x68] sm:$0xff] }
 0x393   :  { %2090 = vpow2.f32 %v993_v33  ;;  %v992_v37 = vmin.f32 %v986_v34, 0.0  ;;  %vm990_vm12 = vcmp.gt.f32.partialorder %v986_v34, 0.0  ;;  %v1392_v33 = vld [vmem:[%s3256_s12 + $0xe0] sm:$0xff]  ;;  %v1391_v36 = vld [vmem:[%s3256_s12 + $0xd8] sm:$0xff] }
 0x395   :  { %v995_v21 = vmul.f32 1.442695, %v992_v37  ;;  %v1375_v37 = vld [vmem:[%s3256_s12 + $0x58] sm:$0xff] }
 0x397   :  { %2092 = vpow2.f32 %v995_v21  ;;  %v1390_v21 = vld [vmem:[%s3256_s12 + $0xd0] sm:$0xff] }
 0x3a0   :  { %v2091_v38 = vpop.eup %2090 }
 0x3a1   :  { %v1794_v23 = vadd.f32 -1.0, %v2091_v38  ;;  %v1374_v38 = vld [vmem:[%s3256_s12 + $0x50] sm:$0xff] }
 0x3a3   :  { %v2970_v39 = vsel %vm989_vm11, %v981_v24, %v1794_v23  ;;  %v1394_v24 = vld [vmem:[%s3256_s12 + $0xf0] sm:$0xff]  ;;  %v1389_v23 = vld [vmem:[%s3256_s12 + $0xc8] sm:$0xff] }
 0x3a4   :  { %v2093_v41 = vpop.eup %2092  ;;  %1796 = vmatmul.mubr.msk.f32.vlgmr.msra.gmra.mxu1 %vm1054_vm10, %v2970_v39 }
 0x3a5   :  { %1969 = vmatpush3.msra.mxu1 %v1036_v27  ;;  %1131 = vmatprep.mubr.f32.mxu1 %v2132_v5  ;;  %v1795_v43 = vadd.f32 -1.0, %v2093_v41  ;;  %v1395_v27 = vld [vmem:[%s3256_s12 + $0xf8] sm:$0xff]  ;;  %v1388_v41 = vld [vmem:[%s3256_s12 + $0xc0] sm:$0xff] }
 0x3a6   :  { %1970 = vmatprep.subr.mxu1 %v1033_v40 }
 0x3a7   :  { %1971 = vmatpush3.msra.mxu1 %v1033_v40  ;;  %v2981_v44 = vsel %vm990_vm12, %v986_v34, %v1795_v43  ;;  %v1376_v34 = vld [vmem:[%s3256_s12 + $0x60] sm:$0xff]  ;;  %v1373_v40 = vld [vmem:[%s3256_s12 + $0x48] sm:$0xff]  ;;  %v1387_v43 = vld [vmem:[%s3256_s12 + $0xb8] sm:$0xff] }
 0x3a8   :  { %1972 = vmatprep.subr.mxu1 %v1030_v42  ;;  %1797 = vmatmul.mubr.msk.f32.gmra.mxu1 %vm1054_vm10, %v2981_v44 }
 0x3a9   :  { %1973 = vmatpush3.msra.mxu1 %v1030_v42  ;;  %1992 = vmatprep.mubr.msk.f32.mxu1 %vm1054_vm10, %v2970_v39  ;;  %v1372_v42 = vld [vmem:[%s3256_s12 + $0x40] sm:$0xff] }
 0x3aa   :  { %1974 = vmatprep.subr.mxu1 %v1027_v17 }
 0x3ab   :  { %1975 = vmatpush3.msra.mxu1 %v1027_v17  ;;  %v1371_v17 = vld [vmem:[%s3256_s12 + $0x38] sm:$0xff] }
 0x3ac   :  { %1976 = vmatprep.subr.mxu1 %v1024_v45 }
 0x3ad   :  { %1977 = vmatpush3.msra.mxu1 %v1024_v45  ;;  %v1386_v45 = vld [vmem:[%s3256_s12 + $0xb0] sm:$0xff] }
 0x3ae   :  { %1978 = vmatprep.subr.mxu1 %v1021_v46 }
 0x3af   :  { %1979 = vmatpush3.msra.mxu1 %v1021_v46  ;;  %v1370_v46 = vld [vmem:[%s3256_s12 + $0x30] sm:$0xff] }
 0x3b0   :  { %1980 = vmatprep.subr.mxu1 %v1018_v20 }
 0x3b1   :  { %1981 = vmatpush3.msra.mxu1 %v1018_v20  ;;  %v1385_v20 = vld [vmem:[%s3256_s12 + $0xa8] sm:$0xff] }
 0x3b2   :  { %1982 = vmatprep.subr.mxu1 %v1015_v47 }
 0x3b3   :  { %1983 = vmatpush3.msra.mxu1 %v1015_v47  ;;  %v1369_v47 = vld [vmem:[%s3256_s12 + $0x28] sm:$0xff] }
 0x3b4   :  { %1984 = vmatprep.subr.mxu1 %v1012_v49 }
 0x3b5   :  { %1985 = vmatpush3.msra.mxu1 %v1012_v49  ;;  %v1384_v49 = vld [vmem:[%s3256_s12 + $0xa0] sm:$0xff] }
 0x3b6   :  { %1986 = vmatprep.subr.mxu1 %v1009_v50 }
 0x3b7   :  { %1987 = vmatpush3.msra.mxu1 %v1009_v50  ;;  %v1368_v50 = vld [vmem:[%s3256_s12 + $0x20] sm:$0xff] }
 0x3b8   :  { %1988 = vmatprep.subr.mxu1 %v1006_v19 }
 0x3b9   :  { %1989 = vmatpush3.msra.mxu1 %v1006_v19  ;;  %v1383_v19 = vld [vmem:[%s3256_s12 + $0x98] sm:$0xff] }
 0x3ba   :  { %1990 = vmatprep.subr.mxu1 %v1003_v51 }
 0x3bb   :  { %1991 = vmatpush3.msra.mxu1 %v1003_v51  ;;  %v1367_v51 = vld [vmem:[%s3256_s12 + $0x18] sm:$0xff] }
 0x3bc   :  { %1993 = vmatmul.mubr.msk.f32.vlgmr.msra.gmra.mxu1 %vm1054_vm10, %v2981_v44 }
 0x3bd   :  { %1287 = vmatprep.mubr.f32.mxu1 %v2132_v5 }
 0x464   :  { %v1127_v55 = vpop.f32.mrf.mxu1 }
 0x465   :  { %v1128_v8 = vadd.f32 %v1127_v55, %v1042_v1  ;;  %v1397_v55 = vld [vmem:[%s3256_s12 + $0x108] sm:$0xff] }
 0x466   :  { %v1129_v63 = vpop.f32.mrf.mxu1  ;;  %2031 = vmatpush3.msra.mxu0 %v1397_v55 }
 0x467   :  { %v1130_v6 = vadd.f32 %v1129_v63, %v1046_v0  ;;  %2032 = vmatprep.subr.mxu0 %v2132_v5 }
 0x468   :  { %v1133_v2 = vpop.f32.mrf.mxu1  ;;  %2033 = vmatpush3.msra.mxu0 %v1396_v54 }
 0x469   :  { %v1134_v3 = vadd.f32 %v1133_v2, %v1042_v1 }
 0x46a   :  { %v1135_v4 = vpop.f32.mrf.mxu1 }
 0x46b   :  { %v1136_v7 = vadd.f32 %v1135_v4, %v1046_v0 }
 0x46d   :  { %2094 = vtanh.f32 %v1136_v7 }
 0x46e   :  { %2096 = vtanh.f32 %v1134_v3 }
 0x46f   :  { %2098 = vtanh.f32 %v1130_v6 }
 0x470   :  { %2100 = vtanh.f32 %v1128_v8 }
 0x47a   :  { %v2095_v11 = vpop.eup %2094 }
 0x47b   :  { %v2097_v12 = vpop.eup %2096  ;;  %1251 = vmatprep.subr.mxu1 %v2095_v11 }
 0x47c   :  { %v2099_v13 = vpop.eup %2098  ;;  %v1994_v29 = vpop.f32.mrf.mxu1  ;;  %1252 = vmatpush1.msra.mxu1 %v2097_v12 }
 0x47d   :  { %v2101_v15 = vpop.eup %2100  ;;  %v1210_v16 = vadd.f32 %v1994_v29, %v1050_v10  ;;  %1253 = vmatprep.subr.mxu1 %v2099_v13 }
 0x47e   :  { %v1204_v18 = vpop.f32.mrf.mxu1  ;;  %1254 = vmatpush1.msra.mxu1 %v2101_v15  ;;  %v1660_v15 = vld [vmem:[%s3259_s15 + $0x58] sm:$0xff] }
 0x47f   :  { %2102 = vtanh.f32 %v1210_v16  ;;  %v1205_v26 = vadd.f32 %v1204_v18, %v1050_v10  ;;  %1800 = vmatmul.mubr.msk.f32.vlgmr.msra.gmra.mxu1 %vm58_vm0, %v1219_v14  ;;  %1995 = vmatprep.subr.mxu1 %v2132_v5  ;;  %v1659_v16 = vld [vmem:[%s3259_s15 + $0x50] sm:$0xff]  ;;  %v1658_v18 = vld [vmem:[%s3259_s15 + $0x48] sm:$0xff] }
 0x480   :  { %1999 = vmatprep.mubr.msk.f32.mxu1 %vm2133_vm13, %v2132_v5  ;;  %2042 = vmatprep.subr.mxu0 %v1660_v15 }
 0x481   :  { %2104 = vtanh.f32 %v1205_v26  ;;  %v1657_v26 = vld [vmem:[%s3259_s15 + $0x40] sm:$0xff] }
 0x48c   :  { %v2103_v22 = vpop.eup %2102 }
 0x48d   :  { %1996 = vmatpush3.msra.mxu1 %v2103_v22  ;;  %v1656_v22 = vld [vmem:[%s3259_s15 + $0x38] sm:$0xff] }
 0x48e   :  { %v2105_v28 = vpop.eup %2104  ;;  %1997 = vmatprep.subr.mxu1 %v2132_v5 }
 0x48f   :  { %1998 = vmatpush3.msra.mxu1 %v2105_v28  ;;  %v1654_v28 = vld [vmem:[%s3259_s15 + $0x28] sm:$0xff] }
 0x490   :  { %2000 = vmatmul.mubr.msk.f32.vlgmr.msra.gmra.mxu1 %vm58_vm0, %v1219_v14  ;;  %1853 = vmatprep.subr.mxu1 %v1395_v27  ;;  %v1655_v27 = vld [vmem:[%s3259_s15 + $0x30] sm:$0xff]  ;;  %vm1565_vm0 = vcmask 23552  }
 0x491   :  { %1854 = vmatpush3.msra.mxu1 %v1379_v30  ;;  %v1653_v30 = vld [vmem:[%s3259_s15 + $0x20] sm:$0xff] }
 0x492   :  { %1855 = vmatprep.subr.mxu1 %v1394_v24  ;;  %v1652_v24 = vld [vmem:[%s3259_s15 + $0x18] sm:$0xff] }
 0x493   :  { %1856 = vmatpush3.msra.mxu1 %v1378_v31 }
 0x494   :  { %1857 = vmatprep.subr.mxu1 %v1393_v32 }
 0x495   :  { %1858 = vmatpush3.msra.mxu1 %v1377_v25 }
 0x496   :  { %1859 = vmatprep.subr.mxu1 %v1392_v33  ;;  %v1651_v33 = vld [vmem:[%s3259_s15 + $0x10] sm:$0xff] }
 0x497   :  { %1860 = vmatpush3.msra.mxu1 %v1376_v34  ;;  %v1650_v34 = vld [vmem:[%s3259_s15 + $0x8] sm:$0xff] }
 0x498   :  { %1861 = vmatprep.subr.mxu1 %v1391_v36  ;;  %v1649_v36 = vld [vmem:[%s3259_s15] sm:$0xff]  ;;  %s2110_s15 = scalar_lea.vmem %s1751_s28, 256 }
 0x499   :  { %1862 = vmatpush3.msra.mxu1 %v1375_v37  ;;  %p2111_p0 = scmp.ne.s32.totalorder %s1751_s28, %s2110_s15  ;;  %p2116_p2 = scmp.lt.s32.totalorder %s2110_s15, %s2110_s15 }
 0x49a   :  { %1863 = vmatprep.subr.mxu1 %v1390_v21 }
 0x49b   :  { %1864 = vmatpush3.msra.mxu1 %v1374_v38  ;;  %p2117_p3 = por %p2116_p2, %p2115_p1 }
 0x49c   :  { %1865 = vmatprep.subr.mxu1 %v1389_v23 }
 0x49d   :  { %1866 = vmatpush3.msra.mxu1 %v1373_v40  ;;  %p2118_p4 = pnand %p2117_p3, %p2111_p0 }
 0x49e   :  { %1867 = vmatprep.subr.mxu1 %v1388_v41 }
 0x49f   :  { %1868 = vmatpush3.msra.mxu1 %v1372_v42 }
 0x4a0   :  { %1869 = vmatprep.subr.mxu1 %v1387_v43 }
 0x4a1   :  { %1870 = vmatpush3.msra.mxu1 %v1371_v17 }
 0x4a2   :  { %1871 = vmatprep.subr.mxu1 %v1386_v45 }
 0x4a3   :  { %1872 = vmatpush3.msra.mxu1 %v1370_v46 }
 0x4a4   :  { %1873 = vmatprep.subr.mxu1 %v1385_v20 }
 0x4a5   :  { %1874 = vmatpush3.msra.mxu1 %v1369_v47 }
 0x4a6   :  { %1875 = vmatprep.subr.mxu1 %v1384_v49 }
 0x4a7   :  { %1876 = vmatpush3.msra.mxu1 %v1368_v50 }
 0x4a8   :  { %1877 = vmatprep.subr.mxu1 %v1383_v19 }
 0x4a9   :  { %1878 = vmatpush3.msra.mxu1 %v1367_v51 }
 0x4aa   :  { %1879 = vmatprep.subr.mxu1 %v1382_v56 }
 0x4ab   :  { %1880 = vmatpush3.msra.mxu1 %v1366_v57 }
 0x4ac   :  { %1881 = vmatprep.subr.mxu1 %v1381_v58 }
 0x4ad   :  { %1882 = vmatpush3.msra.mxu1 %v1365_v59 }
 0x4ae   :  { %1883 = vmatprep.subr.mxu1 %v1380_v61 }
 0x4af   :  { %1884 = vmatpush3.msra.mxu1 %v1364_v62 }
 0x4b0   :  { %2037 = vmatprep.subr.mxu1 %v2132_v5 }
 0x53f   :  { %v1289_v63 = vpop.f32.mrf.mxu1 }
 0x541   :  { %v1291_v0 = vpop.f32.mrf.mxu1 }
 0x542   :  { %1476 = vmatprep.mubr.f32.mxu1 %v1291_v0 }
 0x543   :  { %1477 = vmatmul.mubr.f32.vlgmr.msra.gmra.mxu1 %v1289_v63 }
 0x544   :  { %2039 = vmatprep.mubr.msk.f32.mxu1 %vm2133_vm13, %v2132_v5  ;;  %v1564_v5 = vld [vmem:[%s3258_s14] sm:$0x7] }
 0x545   :  { %2038 = vmatpush3.msk.msra.mxu1 %vm1569_vm15, %v1564_v5 }
 0x550   :  { %v1360_v1 = vpop.f32.mrf.mxu1 }
 0x551   :  { %2035 = vmatmul.mubr.f32.vlgmr.msra.gmra.mxu0 %v1360_v1 }
 0x552   :  { %v2001_v2 = vpop.f32.mrf.mxu1  ;;  %2043 = vmatpush3.msra.mxu0 %v1660_v15 }
 0x553   :  { %2044 = vmatprep.subr.mxu0 %v1659_v16 }
 0x554   :  { %2045 = vmatpush3.msra.mxu0 %v1659_v16 }
 0x555   :  { %2046 = vmatprep.subr.mxu0 %v1658_v18 }
 0x556   :  { %2047 = vmatpush3.msra.mxu0 %v1658_v18 }
 0x557   :  { %2048 = vmatprep.subr.mxu0 %v1657_v26 }
 0x558   :  { %2049 = vmatpush3.msra.mxu0 %v1657_v26 }
 0x559   :  { %2050 = vmatprep.subr.mxu0 %v1656_v22 }
 0x55a   :  { %2051 = vmatpush3.msra.mxu0 %v1656_v22 }
 0x55b   :  { %2052 = vmatprep.subr.mxu0 %v1655_v27 }
 0x55c   :  { %2053 = vmatpush3.msra.mxu0 %v1655_v27 }
 0x55d   :  { %2054 = vmatprep.subr.mxu0 %v1654_v28 }
 0x55e   :  { %2055 = vmatpush3.msra.mxu0 %v1654_v28 }
 0x55f   :  { %2056 = vmatprep.subr.mxu0 %v1653_v30 }
 0x560   :  { %2057 = vmatpush3.msra.mxu0 %v1653_v30 }
 0x561   :  { %2058 = vmatprep.subr.mxu0 %v1652_v24 }
 0x562   :  { %2059 = vmatpush3.msra.mxu0 %v1652_v24 }
 0x563   :  { %2060 = vmatprep.subr.mxu0 %v1651_v33 }
 0x564   :  { %2061 = vmatpush3.msra.mxu0 %v1651_v33 }
 0x565   :  { %2062 = vmatprep.subr.mxu0 %v1650_v34 }
 0x566   :  { %2063 = vmatpush3.msra.mxu0 %v1650_v34 }
 0x567   :  { %2064 = vmatprep.subr.mxu0 %v1649_v36 }
 0x568   :  { %2065 = vmatpush3.msra.mxu0 %v1649_v36 }
 0x603   :  { %v1885_v3 = vpop.f32.mrf.mxu1 }
 0x605   :  { %v1886_v4 = vpop.f32.mrf.mxu1 }
 0x606   :  { %v1887_v6 = vadd.f32 %v1886_v4, %v1885_v3 }
 0x611   :  { %v1548_v7 = vpop.f32.mrf.mxu0 }
 0x612   :  { %v1549_v8 = vadd.f32 %v1887_v6, %v1548_v7 }
 0x613   :  { %v2036_v9 = vpop.f32.mrf.mxu0 }
 0x614   :  { %v1553_v10 = vsel %vm1552_vm14, %v1549_v8, -inf }
 0x615   :  { %1554 = vmax.xlane.f32.xlu1 %v1553_v10 }
 0x69e   :  { %v1555_v11 = vpop.xlane.xlu1 %1554 }
 0x69f   :  { %v1556_v12 = vsub.f32 %v1549_v8, %v1555_v11 }
 0x6a1   :  { %v1557_v13 = vmul.f32 1.442695, %v1556_v12 }
 0x6a3   :  { %2106 = vpow2.f32 %v1557_v13 }
 0x6b0   :  { %v2107_v29 = vpop.eup %2106 }
 0x6b1   :  { %v1559_v14 = vsel %vm1552_vm14, %v2107_v29, 0.0 }
 0x6b2   :  { %1560 = vadd.xlane.f32.xlu1 %v1559_v14 }
 0x73b   :  { %v1561_v31 = vpop.xlane.xlu1 %1560 }
 0x73c   :  { %2108 = vrcp.f32 %v1561_v31 }
 0x749   :  { %v2109_v32 = vpop.eup %2108 }
 0x74a   :  { %v1563_v25 = vmul.f32 %v2109_v32, %v2107_v29 }
 0x74c   :  { %2040 = vmatmul.mubr.msk.f32.vlgmr.msra.gmra.mxu1 %vm1565_vm0, %v1563_v25 }
 0x80c   :  { %v1639_v37 = vpop.f32.mrf.mxu1 }
 0x80d   :  { %v1646_v21 = vrot.slane %v1639_v37, %v2554_v48 }
 0x80e   :  { %v2041_v38 = vpop.f32.mrf.mxu1 }
 0x80f   :  { %v1647_v23 = vmul.f32 %v1646_v21, %v2970_v39  ;;  %v1648_v40 = vmul.f32 %v1646_v21, %v2981_v44 }
 0x811   :  { %2066 = vmatprep.mubr.msk.f32.mxu0 %vm1054_vm10, %v1647_v23 }
 0x812   :  { %2067 = vmatmul.mubr.msk.f32.vlgmr.msra.gmra.mxu0 %vm1054_vm10, %v1648_v40 }
 0x8d2   :  { %v2068_v41 = vpop.f32.mrf.mxu0 }
 0x8d3   :  { %1744 = vst.msk [vmem:[#allocation2 + $0x8] sm:$0xff] %vm1742_vm1, %v2068_v41 }
 0x8d4   :  { %v1733_v42 = vpop.f32.mrf.mxu0 }
 0x8d5   :  { %1743 = vst.msk [vmem:[#allocation2] sm:$0xff] %vm1742_vm1, %v1733_v42 }
 0x8d6   :  { %2121 = shalt.err (!%p2118_p4)
}
 0x8d7   :  { %s2135_s29 = smov 128   ;;  %s2136_s12 = smov 8  }
 0x8d8   :  { %1756 = dma.vmem_to_hbm [thread:$0]  %s1751_s28, 256, %s3260_s16, [#allocation3], %s2135_s29, %s2135_s29, %s2136_s12  }
 0x8d9   :  { %2130 = dma.done.wait [#allocation3], 256  }
 0x8da   :  { %2131 = vsyncadd [#allocation3], 4294967040 }
 0x8db   :  { %1760 = vsyncpa [#allocation3], 1 }

</bundles_post_ra>
